<compile_context>
chip_gen: v6e
topology: v6e:2x2x1
jax: 0.10.0
libtpu: 0.0.40
codegen_flags: <defaults>
</compile_context>

<pallas_src>
import jax
import jax.numpy as jnp
from jax import lax
from jax.experimental import pallas as pl
from jax.experimental.pallas import tpu as pltpu


def _round_up(x, m):
    return (x + m - 1) // m * m


def _make_lstm_kernel(seq_len, t_blk, hp, n_blocks, need_time_mask):
    """Build the recurrent kernel.

    xg_ref : (T_BLK, Bp, 8*Hp)  precomputed gate pre-activations, layout
             [i_f | i_b | f_f | f_b | g_f | g_b | o_f | o_b], each chunk Hp.
    whh_ref: (2*Hp, 8*Hp)       block-diagonal recurrent weights (fwd+bwd).
    wfc_ref: (2*Hp, O_pad)      fc weights arranged for the [h_f | h_b] state.
    bfc_ref: (1, O_pad)         fc bias (lane padded).
    o_ref  : (Bp, O_pad)        classifier output (written on last grid step).
    h_sc/c_sc: (Bp, 2*Hp)       persistent recurrent state [fwd | bwd].
    """
    two_hp = 2 * hp

    def kernel(xg_ref, whh_ref, wfc_ref, bfc_ref, o_ref, h_sc, c_sc):
        blk = pl.program_id(0)

        @pl.when(blk == 0)
        def _init():
            h_sc[...] = jnp.zeros_like(h_sc)
            c_sc[...] = jnp.zeros_like(c_sc)

        def step(j, carry):
            # One timestep for BOTH directions: a single (Bp,2Hp)@(2Hp,8Hp)
            # MXU dot plus elementwise gate math.
            gates = xg_ref[j] + jnp.dot(h_sc[...], whh_ref[...],
                                        preferred_element_type=jnp.float32)
            # sigmoid(x) = 0.5*tanh(0.5*x) + 0.5  (one EUP op per gate).
            i_g = 0.5 * jnp.tanh(0.5 * gates[:, 0 * two_hp:1 * two_hp]) + 0.5
            f_g = 0.5 * jnp.tanh(0.5 * gates[:, 1 * two_hp:2 * two_hp]) + 0.5
            g_g = jnp.tanh(gates[:, 2 * two_hp:3 * two_hp])
            o_g = 0.5 * jnp.tanh(0.5 * gates[:, 3 * two_hp:4 * two_hp]) + 0.5
            c_new = f_g * c_sc[...] + i_g * g_g
            h_new = o_g * jnp.tanh(c_new)
            if need_time_mask:
                # Time padding (S not a multiple of T_BLK): freeze the state
                # on padded steps.
                valid = (blk * t_blk + j) < seq_len
                c_new = jnp.where(valid, c_new, c_sc[...])
                h_new = jnp.where(valid, h_new, h_sc[...])
            c_sc[...] = c_new
            h_sc[...] = h_new
            return carry

        lax.fori_loop(0, t_blk, step, 0, unroll=True)

        # Output block has a constant index_map, so HBM writeback happens once
        # at grid end; only the final-step contents ever leave VMEM.
        @pl.when(blk == n_blocks - 1)
        def _finalize():
            o_ref[...] = (jnp.dot(h_sc[...], wfc_ref[...],
                                  preferred_element_type=jnp.float32)
                          + bfc_ref[...])

    return kernel


def lstm_forward(x_ids, embedding_table, params, *, t_blk=32):
    """x_ids: (seq_len, batch) int32 token ids (PyTorch seq-first layout).
    embedding_table: (vocab, emb_dim) f32.
    params: PyTorch-layout LSTM + fc parameters (see __main__).
    Returns (batch, output_dim) f32."""
    (wih_f, whh_f, bih_f, bhh_f,
     wih_b, whh_b, bih_b, bhh_b,
     w_fc, b_fc) = params

    S, B = x_ids.shape
    H = whh_f.shape[1]
    O = w_fc.shape[0]
    f32 = jnp.float32

    Bp = _round_up(B, 8)                 # f32 sublane count
    Hp = _round_up(H, 64)                # each 2*Hp gate chunk is 128-aligned
    Op = max(128, _round_up(O, 128))     # lane-dense fc output
    t_blk = max(1, min(t_blk, S))
    Sp = _round_up(S, t_blk)
    n_blocks = Sp // t_blk

    # ---- XLA glue: embedding gather + hoisted input projection -------------
    # One (S*Bp, D) @ (D, 4H) matmul per direction replaces S tiny per-step
    # matmuls inside the recurrence. Backward direction consumes reversed time
    # (baked in here via index reversal on the gather).
    emb = embedding_table[x_ids].astype(f32)                     # (S, B, D)
    if Bp != B:
        emb = jnp.pad(emb, ((0, 0), (0, Bp - B), (0, 0)))
    b_f = (bih_f + bhh_f).astype(f32)
    b_b = (bih_b + bhh_b).astype(f32)
    gf = jnp.einsum('sbd,gd->sbg', emb, wih_f.astype(f32)) + b_f   # (S,Bp,4H)
    gb = jnp.einsum('sbd,gd->sbg', emb[::-1], wih_b.astype(f32)) + b_b

    # Interleave per gate: (S,Bp,4,2,Hp) -> (S,Bp,8*Hp)
    # layout [i_f|i_b|f_f|f_b|g_f|g_b|o_f|o_b], each chunk lane-padded to Hp.
    gf = gf.reshape(S, Bp, 4, 1, H)
    gb = gb.reshape(S, Bp, 4, 1, H)
    xg = jnp.concatenate([gf, gb], axis=3)                       # (S,Bp,4,2,H)
    if Hp != H:
        xg = jnp.pad(xg, ((0, 0), (0, 0), (0, 0), (0, 0), (0, Hp - H)))
    xg = xg.reshape(S, Bp, 8 * Hp)
    if Sp != S:
        xg = jnp.pad(xg, ((0, Sp - S), (0, 0), (0, 0)))

    # ---- recurrent + fc weights: fwd/bwd fused, gate-chunk aligned ----------
    # h/c state layout: [h_fwd (Hp) | h_bwd (Hp)].  W_hh is block-diagonal so a
    # single dot yields both directions' gates in the xg layout above.
    whh_c = jnp.zeros((2 * Hp, 8 * Hp), f32)
    for k in range(4):
        whh_c = whh_c.at[0:H, k * 2 * Hp:k * 2 * Hp + H].set(
            whh_f[k * H:(k + 1) * H, :].T.astype(f32))
        whh_c = whh_c.at[Hp:Hp + H, k * 2 * Hp + Hp:k * 2 * Hp + Hp + H].set(
            whh_b[k * H:(k + 1) * H, :].T.astype(f32))
    wfc_c = jnp.zeros((2 * Hp, Op), f32)
    wfc_c = wfc_c.at[0:H, 0:O].set(w_fc[:, 0:H].T.astype(f32))
    wfc_c = wfc_c.at[Hp:Hp + H, 0:O].set(w_fc[:, H:2 * H].T.astype(f32))
    bfc_c = jnp.zeros((1, Op), f32).at[0, 0:O].set(b_fc.astype(f32))

    kernel = _make_lstm_kernel(S, t_blk, Hp, n_blocks, Sp != S)

    out_pad = pl.pallas_call(
        kernel,
        out_shape=jax.ShapeDtypeStruct((Bp, Op), f32),
        grid_spec=pltpu.PrefetchScalarGridSpec(
            num_scalar_prefetch=0,
            grid=(n_blocks,),
            in_specs=[
                # per-block stream of precomputed gate pre-activations
                pl.BlockSpec((t_blk, Bp, 8 * Hp), lambda b: (b, 0, 0)),
                # VMEM-resident weights (constant index_maps)
                pl.BlockSpec((2 * Hp, 8 * Hp), lambda b: (0, 0)),
                pl.BlockSpec((2 * Hp, Op), lambda b: (0, 0)),
                pl.BlockSpec((1, Op), lambda b: (0, 0)),
            ],
            out_specs=pl.BlockSpec((Bp, Op), lambda b: (0, 0)),
            scratch_shapes=[pltpu.VMEM((Bp, 2 * Hp), f32)] * 2,
        ),
        compiler_params=pltpu.CompilerParams(
            dimension_semantics=("arbitrary",)),   # sequential recurrence
    )(xg, whh_c, wfc_c, bfc_c)
    return out_pad[:B, :O]


def _ref_lstm(x_ids, embedding_table, params):
    """Pure-JAX reference with identical (PyTorch) LSTM semantics."""
    (wih_f, whh_f, bih_f, bhh_f,
     wih_b, whh_b, bih_b, bhh_b,
     w_fc, b_fc) = params
    emb = embedding_table[x_ids].astype(jnp.float32)         # (S, B, D)
    S, B, _ = emb.shape
    H = whh_f.shape[1]

    def cell(x, h, c, wih, whh, b):
        gates = x @ wih.T + h @ whh.T + b
        i = jax.nn.sigmoid(gates[:, 0 * H:1 * H])
        f = jax.nn.sigmoid(gates[:, 1 * H:2 * H])
        g = jnp.tanh(gates[:, 2 * H:3 * H])
        o = jax.nn.sigmoid(gates[:, 3 * H:4 * H])
        c = f * c + i * g
        h = o * jnp.tanh(c)
        return h, c

    h_f = jnp.zeros((B, H), jnp.float32)
    c_f = jnp.zeros((B, H), jnp.float32)
    for t in range(S):
        h_f, c_f = cell(emb[t], h_f, c_f, wih_f, whh_f, bih_f + bhh_f)

    h_b = jnp.zeros((B, H), jnp.float32)
    c_b = jnp.zeros((B, H), jnp.float32)
    for t in range(S - 1, -1, -1):
        h_b, c_b = cell(emb[t], h_b, c_b, wih_b, whh_b, bih_b + bhh_b)

    return jnp.concatenate([h_f, h_b], axis=1) @ w_fc.T + b_fc


if __name__ == "__main__":
    # Small deterministic shapes consistent with the module.
    vocab_size = 50
    embedding_dim = 32
    hidden_dim = 32
    output_dim = 8
    seq_len = 8
    batch = 2

    key = jax.random.PRNGKey(0)
    ks = jax.random.split(key, 12)

    def rnd(k, shape, scale=0.1):
        return jax.random.normal(k, shape, dtype=jnp.float32) * scale

    embedding_table = rnd(ks[0], (vocab_size, embedding_dim), 1.0)
    # PyTorch nn.LSTM parameter layout: weight_ih (4H, D), weight_hh (4H, H),
    # biases (4H,) for each direction; nn.Linear weight (O, 2H), bias (O,).
    wih_f = rnd(ks[1], (4 * hidden_dim, embedding_dim))
    whh_f = rnd(ks[2], (4 * hidden_dim, hidden_dim))
    bih_f = rnd(ks[3], (4 * hidden_dim,))
    bhh_f = rnd(ks[4], (4 * hidden_dim,))
    wih_b = rnd(ks[5], (4 * hidden_dim, embedding_dim))
    whh_b = rnd(ks[6], (4 * hidden_dim, hidden_dim))
    bih_b = rnd(ks[7], (4 * hidden_dim,))
    bhh_b = rnd(ks[8], (4 * hidden_dim,))
    w_fc = rnd(ks[9], (output_dim, 2 * hidden_dim))
    b_fc = rnd(ks[10], (output_dim,))

    # x in PyTorch layout: (seq_len, batch) int token ids.
    x_ids = jax.random.randint(
        ks[11], (seq_len, batch), 0, vocab_size, dtype=jnp.int32)

    params = (wih_f, whh_f, bih_f, bhh_f,
              wih_b, whh_b, bih_b, bhh_b,
              w_fc, b_fc)

    out = lstm_forward(x_ids, embedding_table, params)
    out = jax.block_until_ready(out)

    ref = _ref_lstm(x_ids, embedding_table, params)
    assert out.shape == (batch, output_dim)
    assert jnp.allclose(out, ref, atol=2e-3, rtol=2e-3), (
        float(jnp.max(jnp.abs(out - ref))))

    print("KERNEL_OK")
</pallas_src>

<mosaic_0001>
module attributes {stable_mosaic.version = 11 : i64} {
  func.func @kernel(%arg0: i32, %arg1: memref<8x8x512xf32, #tpu.memory_space<vmem>>, %arg2: memref<128x512xf32, #tpu.memory_space<vmem>>, %arg3: memref<128x128xf32, #tpu.memory_space<vmem>>, %arg4: memref<1x128xf32, #tpu.memory_space<vmem>>, %arg5: memref<8x128xf32, #tpu.memory_space<vmem>>, %arg6: memref<8x128xf32, #tpu.memory_space<vmem>>, %arg7: memref<8x128xf32, #tpu.memory_space<vmem>>) attributes {dimension_semantics = [#tpu.dimension_semantics<arbitrary>], iteration_bounds = array<i64: 1>, scalar_prefetch = 0 : i64, scratch_operands = 2 : i64, tpu.core_type = #tpu.core_type<tc>, window_params = [{transform_indices = @transform_0, window_bounds = array<i64: 8, 8, 512>}, {pipeline_mode = #tpu.pipeline_mode<synchronous>, transform_indices = @transform_1, window_bounds = array<i64: 128, 512>}, {pipeline_mode = #tpu.pipeline_mode<synchronous>, transform_indices = @transform_2, window_bounds = array<i64: 128, 128>}, {pipeline_mode = #tpu.pipeline_mode<synchronous>, transform_indices = @transform_3, window_bounds = array<i64: 1, 128>}, {pipeline_mode = #tpu.pipeline_mode<synchronous>, transform_indices = @transform_4, window_bounds = array<i64: 8, 128>}]} {
    %c0_i32 = arith.constant 0 : i32
    %0 = arith.cmpi eq, %arg0, %c0_i32 : i32
    %1 = arith.extui %0 : i1 to i32
    %c0_i32_0 = arith.constant 0 : i32
    %2 = arith.cmpi ne, %1, %c0_i32_0 : i32
    scf.if %2 {
      %cst_178 = arith.constant 0.000000e+00 : f32
      %334 = vector.broadcast %cst_178 : f32 to vector<8x128xf32>
      %c0_179 = arith.constant 0 : index
      %c0_180 = arith.constant 0 : index
      %335 = vector.load %arg6[%c0_179, %c0_180] : memref<8x128xf32, #tpu.memory_space<vmem>>, vector<8x128xf32>
      tpu.vector_store %arg6[%c0_179, %c0_180], %334 {strides = array<i32>} : memref<8x128xf32, #tpu.memory_space<vmem>>, vector<8x128xf32>,
      %cst_181 = arith.constant 0.000000e+00 : f32
      %336 = vector.broadcast %cst_181 : f32 to vector<8x128xf32>
      %c0_182 = arith.constant 0 : index
      %c0_183 = arith.constant 0 : index
      %337 = vector.load %arg7[%c0_182, %c0_183] : memref<8x128xf32, #tpu.memory_space<vmem>>, vector<8x128xf32>
      tpu.vector_store %arg7[%c0_182, %c0_183], %336 {strides = array<i32>} : memref<8x128xf32, #tpu.memory_space<vmem>>, vector<8x128xf32>,
    } else {
    }
    %c0_i32_1 = arith.constant 0 : i32
    %3 = arith.index_cast %c0_i32_1 : i32 to index
    %c0 = arith.constant 0 : index
    %c0_2 = arith.constant 0 : index
    %4 = vector.load %arg1[%3, %c0, %c0_2] : memref<8x8x512xf32, #tpu.memory_space<vmem>>, vector<1x8x512xf32>
    %5 = vector.shape_cast %4 : vector<1x8x512xf32> to vector<8x512xf32>
    %c0_3 = arith.constant 0 : index
    %c0_4 = arith.constant 0 : index
    %6 = vector.load %arg6[%c0_3, %c0_4] : memref<8x128xf32, #tpu.memory_space<vmem>>, vector<8x128xf32>
    %c0_5 = arith.constant 0 : index
    %c0_6 = arith.constant 0 : index
    %7 = vector.load %arg2[%c0_5, %c0_6] : memref<128x512xf32, #tpu.memory_space<vmem>>, vector<128x512xf32>
    %cst = arith.constant dense<0.000000e+00> : vector<8x512xf32>
    %8 = tpu.matmul %6, %7, %cst {dimension_numbers = #tpu.dot_dimension_numbers<[1], [0], [0], [1], [0, 0, 1, 1], [], []>} : vector<8x128xf32>, vector<128x512xf32>, vector<8x512xf32> -> vector<8x512xf32>
    %9 = arith.addf %5, %8 : vector<8x512xf32>
    %10 = vector.extract_strided_slice %9 {offsets = [0, 0], sizes = [8, 128], strides = [1, 1]} : vector<8x512xf32> to vector<8x128xf32>
    %cst_7 = arith.constant 5.000000e-01 : f32
    %11 = vector.broadcast %cst_7 : f32 to vector<8x128xf32>
    %12 = arith.mulf %11, %10 : vector<8x128xf32>
    %13 = math.tanh %12 : vector<8x128xf32>
    %cst_8 = arith.constant 5.000000e-01 : f32
    %14 = vector.broadcast %cst_8 : f32 to vector<8x128xf32>
    %15 = arith.mulf %14, %13 : vector<8x128xf32>
    %cst_9 = arith.constant 5.000000e-01 : f32
    %16 = vector.broadcast %cst_9 : f32 to vector<8x128xf32>
    %17 = arith.addf %15, %16 : vector<8x128xf32>
    %18 = vector.extract_strided_slice %9 {offsets = [0, 128], sizes = [8, 128], strides = [1, 1]} : vector<8x512xf32> to vector<8x128xf32>
    %cst_10 = arith.constant 5.000000e-01 : f32
    %19 = vector.broadcast %cst_10 : f32 to vector<8x128xf32>
    %20 = arith.mulf %19, %18 : vector<8x128xf32>
    %21 = math.tanh %20 : vector<8x128xf32>
    %cst_11 = arith.constant 5.000000e-01 : f32
    %22 = vector.broadcast %cst_11 : f32 to vector<8x128xf32>
    %23 = arith.mulf %22, %21 : vector<8x128xf32>
    %cst_12 = arith.constant 5.000000e-01 : f32
    %24 = vector.broadcast %cst_12 : f32 to vector<8x128xf32>
    %25 = arith.addf %23, %24 : vector<8x128xf32>
    %26 = vector.extract_strided_slice %9 {offsets = [0, 256], sizes = [8, 128], strides = [1, 1]} : vector<8x512xf32> to vector<8x128xf32>
    %27 = math.tanh %26 : vector<8x128xf32>
    %28 = vector.extract_strided_slice %9 {offsets = [0, 384], sizes = [8, 128], strides = [1, 1]} : vector<8x512xf32> to vector<8x128xf32>
    %cst_13 = arith.constant 5.000000e-01 : f32
    %29 = vector.broadcast %cst_13 : f32 to vector<8x128xf32>
    %30 = arith.mulf %29, %28 : vector<8x128xf32>
    %31 = math.tanh %30 : vector<8x128xf32>
    %cst_14 = arith.constant 5.000000e-01 : f32
    %32 = vector.broadcast %cst_14 : f32 to vector<8x128xf32>
    %33 = arith.mulf %32, %31 : vector<8x128xf32>
    %cst_15 = arith.constant 5.000000e-01 : f32
    %34 = vector.broadcast %cst_15 : f32 to vector<8x128xf32>
    %35 = arith.addf %33, %34 : vector<8x128xf32>
    %c0_16 = arith.constant 0 : index
    %c0_17 = arith.constant 0 : index
    %36 = vector.load %arg7[%c0_16, %c0_17] : memref<8x128xf32, #tpu.memory_space<vmem>>, vector<8x128xf32>
    %37 = arith.mulf %25, %36 : vector<8x128xf32>
    %38 = arith.mulf %17, %27 : vector<8x128xf32>
    %39 = arith.addf %37, %38 : vector<8x128xf32>
    %40 = math.tanh %39 : vector<8x128xf32>
    %41 = arith.mulf %35, %40 : vector<8x128xf32>
    %c0_18 = arith.constant 0 : index
    %c0_19 = arith.constant 0 : index
    %42 = vector.load %arg7[%c0_18, %c0_19] : memref<8x128xf32, #tpu.memory_space<vmem>>, vector<8x128xf32>
    tpu.vector_store %arg7[%c0_18, %c0_19], %39 {strides = array<i32>} : memref<8x128xf32, #tpu.memory_space<vmem>>, vector<8x128xf32>,
    %c0_20 = arith.constant 0 : index
    %c0_21 = arith.constant 0 : index
    %43 = vector.load %arg6[%c0_20, %c0_21] : memref<8x128xf32, #tpu.memory_space<vmem>>, vector<8x128xf32>
    tpu.vector_store %arg6[%c0_20, %c0_21], %41 {strides = array<i32>} : memref<8x128xf32, #tpu.memory_space<vmem>>, vector<8x128xf32>,
    %c1_i32 = arith.constant 1 : i32
    %44 = arith.index_cast %c1_i32 : i32 to index
    %c0_22 = arith.constant 0 : index
    %c0_23 = arith.constant 0 : index
    %45 = vector.load %arg1[%44, %c0_22, %c0_23] : memref<8x8x512xf32, #tpu.memory_space<vmem>>, vector<1x8x512xf32>
    %46 = vector.shape_cast %45 : vector<1x8x512xf32> to vector<8x512xf32>
    %c0_24 = arith.constant 0 : index
    %c0_25 = arith.constant 0 : index
    %47 = vector.load %arg6[%c0_24, %c0_25] : memref<8x128xf32, #tpu.memory_space<vmem>>, vector<8x128xf32>
    %c0_26 = arith.constant 0 : index
    %c0_27 = arith.constant 0 : index
    %48 = vector.load %arg2[%c0_26, %c0_27] : memref<128x512xf32, #tpu.memory_space<vmem>>, vector<128x512xf32>
    %cst_28 = arith.constant dense<0.000000e+00> : vector<8x512xf32>
    %49 = tpu.matmul %47, %48, %cst_28 {dimension_numbers = #tpu.dot_dimension_numbers<[1], [0], [0], [1], [0, 0, 1, 1], [], []>} : vector<8x128xf32>, vector<128x512xf32>, vector<8x512xf32> -> vector<8x512xf32>
    %50 = arith.addf %46, %49 : vector<8x512xf32>
    %51 = vector.extract_strided_slice %50 {offsets = [0, 0], sizes = [8, 128], strides = [1, 1]} : vector<8x512xf32> to vector<8x128xf32>
    %cst_29 = arith.constant 5.000000e-01 : f32
    %52 = vector.broadcast %cst_29 : f32 to vector<8x128xf32>
    %53 = arith.mulf %52, %51 : vector<8x128xf32>
    %54 = math.tanh %53 : vector<8x128xf32>
    %cst_30 = arith.constant 5.000000e-01 : f32
    %55 = vector.broadcast %cst_30 : f32 to vector<8x128xf32>
    %56 = arith.mulf %55, %54 : vector<8x128xf32>
    %cst_31 = arith.constant 5.000000e-01 : f32
    %57 = vector.broadcast %cst_31 : f32 to vector<8x128xf32>
    %58 = arith.addf %56, %57 : vector<8x128xf32>
    %59 = vector.extract_strided_slice %50 {offsets = [0, 128], sizes = [8, 128], strides = [1, 1]} : vector<8x512xf32> to vector<8x128xf32>
    %cst_32 = arith.constant 5.000000e-01 : f32
    %60 = vector.broadcast %cst_32 : f32 to vector<8x128xf32>
    %61 = arith.mulf %60, %59 : vector<8x128xf32>
    %62 = math.tanh %61 : vector<8x128xf32>
    %cst_33 = arith.constant 5.000000e-01 : f32
    %63 = vector.broadcast %cst_33 : f32 to vector<8x128xf32>
    %64 = arith.mulf %63, %62 : vector<8x128xf32>
    %cst_34 = arith.constant 5.000000e-01 : f32
    %65 = vector.broadcast %cst_34 : f32 to vector<8x128xf32>
    %66 = arith.addf %64, %65 : vector<8x128xf32>
    %67 = vector.extract_strided_slice %50 {offsets = [0, 256], sizes = [8, 128], strides = [1, 1]} : vector<8x512xf32> to vector<8x128xf32>
    %68 = math.tanh %67 : vector<8x128xf32>
    %69 = vector.extract_strided_slice %50 {offsets = [0, 384], sizes = [8, 128], strides = [1, 1]} : vector<8x512xf32> to vector<8x128xf32>
    %cst_35 = arith.constant 5.000000e-01 : f32
    %70 = vector.broadcast %cst_35 : f32 to vector<8x128xf32>
    %71 = arith.mulf %70, %69 : vector<8x128xf32>
    %72 = math.tanh %71 : vector<8x128xf32>
    %cst_36 = arith.constant 5.000000e-01 : f32
    %73 = vector.broadcast %cst_36 : f32 to vector<8x128xf32>
    %74 = arith.mulf %73, %72 : vector<8x128xf32>
    %cst_37 = arith.constant 5.000000e-01 : f32
    %75 = vector.broadcast %cst_37 : f32 to vector<8x128xf32>
    %76 = arith.addf %74, %75 : vector<8x128xf32>
    %c0_38 = arith.constant 0 : index
    %c0_39 = arith.constant 0 : index
    %77 = vector.load %arg7[%c0_38, %c0_39] : memref<8x128xf32, #tpu.memory_space<vmem>>, vector<8x128xf32>
    %78 = arith.mulf %66, %77 : vector<8x128xf32>
    %79 = arith.mulf %58, %68 : vector<8x128xf32>
    %80 = arith.addf %78, %79 : vector<8x128xf32>
    %81 = math.tanh %80 : vector<8x128xf32>
    %82 = arith.mulf %76, %81 : vector<8x128xf32>
    %c0_40 = arith.constant 0 : index
    %c0_41 = arith.constant 0 : index
    %83 = vector.load %arg7[%c0_40, %c0_41] : memref<8x128xf32, #tpu.memory_space<vmem>>, vector<8x128xf32>
    tpu.vector_store %arg7[%c0_40, %c0_41], %80 {strides = array<i32>} : memref<8x128xf32, #tpu.memory_space<vmem>>, vector<8x128xf32>,
    %c0_42 = arith.constant 0 : index
    %c0_43 = arith.constant 0 : index
    %84 = vector.load %arg6[%c0_42, %c0_43] : memref<8x128xf32, #tpu.memory_space<vmem>>, vector<8x128xf32>
    tpu.vector_store %arg6[%c0_42, %c0_43], %82 {strides = array<i32>} : memref<8x128xf32, #tpu.memory_space<vmem>>, vector<8x128xf32>,
    %c2_i32 = arith.constant 2 : i32
    %85 = arith.index_cast %c2_i32 : i32 to index
    %c0_44 = arith.constant 0 : index
    %c0_45 = arith.constant 0 : index
    %86 = vector.load %arg1[%85, %c0_44, %c0_45] : memref<8x8x512xf32, #tpu.memory_space<vmem>>, vector<1x8x512xf32>
    %87 = vector.shape_cast %86 : vector<1x8x512xf32> to vector<8x512xf32>
    %c0_46 = arith.constant 0 : index
    %c0_47 = arith.constant 0 : index
    %88 = vector.load %arg6[%c0_46, %c0_47] : memref<8x128xf32, #tpu.memory_space<vmem>>, vector<8x128xf32>
    %c0_48 = arith.constant 0 : index
    %c0_49 = arith.constant 0 : index
    %89 = vector.load %arg2[%c0_48, %c0_49] : memref<128x512xf32, #tpu.memory_space<vmem>>, vector<128x512xf32>
    %cst_50 = arith.constant dense<0.000000e+00> : vector<8x512xf32>
    %90 = tpu.matmul %88, %89, %cst_50 {dimension_numbers = #tpu.dot_dimension_numbers<[1], [0], [0], [1], [0, 0, 1, 1], [], []>} : vector<8x128xf32>, vector<128x512xf32>, vector<8x512xf32> -> vector<8x512xf32>
    %91 = arith.addf %87, %90 : vector<8x512xf32>
    %92 = vector.extract_strided_slice %91 {offsets = [0, 0], sizes = [8, 128], strides = [1, 1]} : vector<8x512xf32> to vector<8x128xf32>
    %cst_51 = arith.constant 5.000000e-01 : f32
    %93 = vector.broadcast %cst_51 : f32 to vector<8x128xf32>
    %94 = arith.mulf %93, %92 : vector<8x128xf32>
    %95 = math.tanh %94 : vector<8x128xf32>
    %cst_52 = arith.constant 5.000000e-01 : f32
    %96 = vector.broadcast %cst_52 : f32 to vector<8x128xf32>
    %97 = arith.mulf %96, %95 : vector<8x128xf32>
    %cst_53 = arith.constant 5.000000e-01 : f32
    %98 = vector.broadcast %cst_53 : f32 to vector<8x128xf32>
    %99 = arith.addf %97, %98 : vector<8x128xf32>
    %100 = vector.extract_strided_slice %91 {offsets = [0, 128], sizes = [8, 128], strides = [1, 1]} : vector<8x512xf32> to vector<8x128xf32>
    %cst_54 = arith.constant 5.000000e-01 : f32
    %101 = vector.broadcast %cst_54 : f32 to vector<8x128xf32>
    %102 = arith.mulf %101, %100 : vector<8x128xf32>
    %103 = math.tanh %102 : vector<8x128xf32>
    %cst_55 = arith.constant 5.000000e-01 : f32
    %104 = vector.broadcast %cst_55 : f32 to vector<8x128xf32>
    %105 = arith.mulf %104, %103 : vector<8x128xf32>
    %cst_56 = arith.constant 5.000000e-01 : f32
    %106 = vector.broadcast %cst_56 : f32 to vector<8x128xf32>
    %107 = arith.addf %105, %106 : vector<8x128xf32>
    %108 = vector.extract_strided_slice %91 {offsets = [0, 256], sizes = [8, 128], strides = [1, 1]} : vector<8x512xf32> to vector<8x128xf32>
    %109 = math.tanh %108 : vector<8x128xf32>
    %110 = vector.extract_strided_slice %91 {offsets = [0, 384], sizes = [8, 128], strides = [1, 1]} : vector<8x512xf32> to vector<8x128xf32>
    %cst_57 = arith.constant 5.000000e-01 : f32
    %111 = vector.broadcast %cst_57 : f32 to vector<8x128xf32>
    %112 = arith.mulf %111, %110 : vector<8x128xf32>
    %113 = math.tanh %112 : vector<8x128xf32>
    %cst_58 = arith.constant 5.000000e-01 : f32
    %114 = vector.broadcast %cst_58 : f32 to vector<8x128xf32>
    %115 = arith.mulf %114, %113 : vector<8x128xf32>
    %cst_59 = arith.constant 5.000000e-01 : f32
    %116 = vector.broadcast %cst_59 : f32 to vector<8x128xf32>
    %117 = arith.addf %115, %116 : vector<8x128xf32>
    %c0_60 = arith.constant 0 : index
    %c0_61 = arith.constant 0 : index
    %118 = vector.load %arg7[%c0_60, %c0_61] : memref<8x128xf32, #tpu.memory_space<vmem>>, vector<8x128xf32>
    %119 = arith.mulf %107, %118 : vector<8x128xf32>
    %120 = arith.mulf %99, %109 : vector<8x128xf32>
    %121 = arith.addf %119, %120 : vector<8x128xf32>
    %122 = math.tanh %121 : vector<8x128xf32>
    %123 = arith.mulf %117, %122 : vector<8x128xf32>
    %c0_62 = arith.constant 0 : index
    %c0_63 = arith.constant 0 : index
    %124 = vector.load %arg7[%c0_62, %c0_63] : memref<8x128xf32, #tpu.memory_space<vmem>>, vector<8x128xf32>
    tpu.vector_store %arg7[%c0_62, %c0_63], %121 {strides = array<i32>} : memref<8x128xf32, #tpu.memory_space<vmem>>, vector<8x128xf32>,
    %c0_64 = arith.constant 0 : index
    %c0_65 = arith.constant 0 : index
    %125 = vector.load %arg6[%c0_64, %c0_65] : memref<8x128xf32, #tpu.memory_space<vmem>>, vector<8x128xf32>
    tpu.vector_store %arg6[%c0_64, %c0_65], %123 {strides = array<i32>} : memref<8x128xf32, #tpu.memory_space<vmem>>, vector<8x128xf32>,
    %c3_i32 = arith.constant 3 : i32
    %126 = arith.index_cast %c3_i32 : i32 to index
    %c0_66 = arith.constant 0 : index
    %c0_67 = arith.constant 0 : index
    %127 = vector.load %arg1[%126, %c0_66, %c0_67] : memref<8x8x512xf32, #tpu.memory_space<vmem>>, vector<1x8x512xf32>
    %128 = vector.shape_cast %127 : vector<1x8x512xf32> to vector<8x512xf32>
    %c0_68 = arith.constant 0 : index
    %c0_69 = arith.constant 0 : index
    %129 = vector.load %arg6[%c0_68, %c0_69] : memref<8x128xf32, #tpu.memory_space<vmem>>, vector<8x128xf32>
    %c0_70 = arith.constant 0 : index
    %c0_71 = arith.constant 0 : index
    %130 = vector.load %arg2[%c0_70, %c0_71] : memref<128x512xf32, #tpu.memory_space<vmem>>, vector<128x512xf32>
    %cst_72 = arith.constant dense<0.000000e+00> : vector<8x512xf32>
    %131 = tpu.matmul %129, %130, %cst_72 {dimension_numbers = #tpu.dot_dimension_numbers<[1], [0], [0], [1], [0, 0, 1, 1], [], []>} : vector<8x128xf32>, vector<128x512xf32>, vector<8x512xf32> -> vector<8x512xf32>
    %132 = arith.addf %128, %131 : vector<8x512xf32>
    %133 = vector.extract_strided_slice %132 {offsets = [0, 0], sizes = [8, 128], strides = [1, 1]} : vector<8x512xf32> to vector<8x128xf32>
    %cst_73 = arith.constant 5.000000e-01 : f32
    %134 = vector.broadcast %cst_73 : f32 to vector<8x128xf32>
    %135 = arith.mulf %134, %133 : vector<8x128xf32>
    %136 = math.tanh %135 : vector<8x128xf32>
    %cst_74 = arith.constant 5.000000e-01 : f32
    %137 = vector.broadcast %cst_74 : f32 to vector<8x128xf32>
    %138 = arith.mulf %137, %136 : vector<8x128xf32>
    %cst_75 = arith.constant 5.000000e-01 : f32
    %139 = vector.broadcast %cst_75 : f32 to vector<8x128xf32>
    %140 = arith.addf %138, %139 : vector<8x128xf32>
    %141 = vector.extract_strided_slice %132 {offsets = [0, 128], sizes = [8, 128], strides = [1, 1]} : vector<8x512xf32> to vector<8x128xf32>
    %cst_76 = arith.constant 5.000000e-01 : f32
    %142 = vector.broadcast %cst_76 : f32 to vector<8x128xf32>
    %143 = arith.mulf %142, %141 : vector<8x128xf32>
    %144 = math.tanh %143 : vector<8x128xf32>
    %cst_77 = arith.constant 5.000000e-01 : f32
    %145 = vector.broadcast %cst_77 : f32 to vector<8x128xf32>
    %146 = arith.mulf %145, %144 : vector<8x128xf32>
    %cst_78 = arith.constant 5.000000e-01 : f32
    %147 = vector.broadcast %cst_78 : f32 to vector<8x128xf32>
    %148 = arith.addf %146, %147 : vector<8x128xf32>
    %149 = vector.extract_strided_slice %132 {offsets = [0, 256], sizes = [8, 128], strides = [1, 1]} : vector<8x512xf32> to vector<8x128xf32>
    %150 = math.tanh %149 : vector<8x128xf32>
    %151 = vector.extract_strided_slice %132 {offsets = [0, 384], sizes = [8, 128], strides = [1, 1]} : vector<8x512xf32> to vector<8x128xf32>
    %cst_79 = arith.constant 5.000000e-01 : f32
    %152 = vector.broadcast %cst_79 : f32 to vector<8x128xf32>
    %153 = arith.mulf %152, %151 : vector<8x128xf32>
    %154 = math.tanh %153 : vector<8x128xf32>
    %cst_80 = arith.constant 5.000000e-01 : f32
    %155 = vector.broadcast %cst_80 : f32 to vector<8x128xf32>
    %156 = arith.mulf %155, %154 : vector<8x128xf32>
    %cst_81 = arith.constant 5.000000e-01 : f32
    %157 = vector.broadcast %cst_81 : f32 to vector<8x128xf32>
    %158 = arith.addf %156, %157 : vector<8x128xf32>
    %c0_82 = arith.constant 0 : index
    %c0_83 = arith.constant 0 : index
    %159 = vector.load %arg7[%c0_82, %c0_83] : memref<8x128xf32, #tpu.memory_space<vmem>>, vector<8x128xf32>
    %160 = arith.mulf %148, %159 : vector<8x128xf32>
    %161 = arith.mulf %140, %150 : vector<8x128xf32>
    %162 = arith.addf %160, %161 : vector<8x128xf32>
    %163 = math.tanh %162 : vector<8x128xf32>
    %164 = arith.mulf %158, %163 : vector<8x128xf32>
    %c0_84 = arith.constant 0 : index
    %c0_85 = arith.constant 0 : index
    %165 = vector.load %arg7[%c0_84, %c0_85] : memref<8x128xf32, #tpu.memory_space<vmem>>, vector<8x128xf32>
    tpu.vector_store %arg7[%c0_84, %c0_85], %162 {strides = array<i32>} : memref<8x128xf32, #tpu.memory_space<vmem>>, vector<8x128xf32>,
    %c0_86 = arith.constant 0 : index
    %c0_87 = arith.constant 0 : index
    %166 = vector.load %arg6[%c0_86, %c0_87] : memref<8x128xf32, #tpu.memory_space<vmem>>, vector<8x128xf32>
    tpu.vector_store %arg6[%c0_86, %c0_87], %164 {strides = array<i32>} : memref<8x128xf32, #tpu.memory_space<vmem>>, vector<8x128xf32>,
    %c4_i32 = arith.constant 4 : i32
    %167 = arith.index_cast %c4_i32 : i32 to index
    %c0_88 = arith.constant 0 : index
    %c0_89 = arith.constant 0 : index
    %168 = vector.load %arg1[%167, %c0_88, %c0_89] : memref<8x8x512xf32, #tpu.memory_space<vmem>>, vector<1x8x512xf32>
    %169 = vector.shape_cast %168 : vector<1x8x512xf32> to vector<8x512xf32>
    %c0_90 = arith.constant 0 : index
    %c0_91 = arith.constant 0 : index
    %170 = vector.load %arg6[%c0_90, %c0_91] : memref<8x128xf32, #tpu.memory_space<vmem>>, vector<8x128xf32>
    %c0_92 = arith.constant 0 : index
    %c0_93 = arith.constant 0 : index
    %171 = vector.load %arg2[%c0_92, %c0_93] : memref<128x512xf32, #tpu.memory_space<vmem>>, vector<128x512xf32>
    %cst_94 = arith.constant dense<0.000000e+00> : vector<8x512xf32>
    %172 = tpu.matmul %170, %171, %cst_94 {dimension_numbers = #tpu.dot_dimension_numbers<[1], [0], [0], [1], [0, 0, 1, 1], [], []>} : vector<8x128xf32>, vector<128x512xf32>, vector<8x512xf32> -> vector<8x512xf32>
    %173 = arith.addf %169, %172 : vector<8x512xf32>
    %174 = vector.extract_strided_slice %173 {offsets = [0, 0], sizes = [8, 128], strides = [1, 1]} : vector<8x512xf32> to vector<8x128xf32>
    %cst_95 = arith.constant 5.000000e-01 : f32
    %175 = vector.broadcast %cst_95 : f32 to vector<8x128xf32>
    %176 = arith.mulf %175, %174 : vector<8x128xf32>
    %177 = math.tanh %176 : vector<8x128xf32>
    %cst_96 = arith.constant 5.000000e-01 : f32
    %178 = vector.broadcast %cst_96 : f32 to vector<8x128xf32>
    %179 = arith.mulf %178, %177 : vector<8x128xf32>
    %cst_97 = arith.constant 5.000000e-01 : f32
    %180 = vector.broadcast %cst_97 : f32 to vector<8x128xf32>
    %181 = arith.addf %179, %180 : vector<8x128xf32>
    %182 = vector.extract_strided_slice %173 {offsets = [0, 128], sizes = [8, 128], strides = [1, 1]} : vector<8x512xf32> to vector<8x128xf32>
    %cst_98 = arith.constant 5.000000e-01 : f32
    %183 = vector.broadcast %cst_98 : f32 to vector<8x128xf32>
    %184 = arith.mulf %183, %182 : vector<8x128xf32>
    %185 = math.tanh %184 : vector<8x128xf32>
    %cst_99 = arith.constant 5.000000e-01 : f32
    %186 = vector.broadcast %cst_99 : f32 to vector<8x128xf32>
    %187 = arith.mulf %186, %185 : vector<8x128xf32>
    %cst_100 = arith.constant 5.000000e-01 : f32
    %188 = vector.broadcast %cst_100 : f32 to vector<8x128xf32>
    %189 = arith.addf %187, %188 : vector<8x128xf32>
    %190 = vector.extract_strided_slice %173 {offsets = [0, 256], sizes = [8, 128], strides = [1, 1]} : vector<8x512xf32> to vector<8x128xf32>
    %191 = math.tanh %190 : vector<8x128xf32>
    %192 = vector.extract_strided_slice %173 {offsets = [0, 384], sizes = [8, 128], strides = [1, 1]} : vector<8x512xf32> to vector<8x128xf32>
    %cst_101 = arith.constant 5.000000e-01 : f32
    %193 = vector.broadcast %cst_101 : f32 to vector<8x128xf32>
    %194 = arith.mulf %193, %192 : vector<8x128xf32>
    %195 = math.tanh %194 : vector<8x128xf32>
    %cst_102 = arith.constant 5.000000e-01 : f32
    %196 = vector.broadcast %cst_102 : f32 to vector<8x128xf32>
    %197 = arith.mulf %196, %195 : vector<8x128xf32>
    %cst_103 = arith.constant 5.000000e-01 : f32
    %198 = vector.broadcast %cst_103 : f32 to vector<8x128xf32>
    %199 = arith.addf %197, %198 : vector<8x128xf32>
    %c0_104 = arith.constant 0 : index
    %c0_105 = arith.constant 0 : index
    %200 = vector.load %arg7[%c0_104, %c0_105] : memref<8x128xf32, #tpu.memory_space<vmem>>, vector<8x128xf32>
    %201 = arith.mulf %189, %200 : vector<8x128xf32>
    %202 = arith.mulf %181, %191 : vector<8x128xf32>
    %203 = arith.addf %201, %202 : vector<8x128xf32>
    %204 = math.tanh %203 : vector<8x128xf32>
    %205 = arith.mulf %199, %204 : vector<8x128xf32>
    %c0_106 = arith.constant 0 : index
    %c0_107 = arith.constant 0 : index
    %206 = vector.load %arg7[%c0_106, %c0_107] : memref<8x128xf32, #tpu.memory_space<vmem>>, vector<8x128xf32>
    tpu.vector_store %arg7[%c0_106, %c0_107], %203 {strides = array<i32>} : memref<8x128xf32, #tpu.memory_space<vmem>>, vector<8x128xf32>,
    %c0_108 = arith.constant 0 : index
    %c0_109 = arith.constant 0 : index
    %207 = vector.load %arg6[%c0_108, %c0_109] : memref<8x128xf32, #tpu.memory_space<vmem>>, vector<8x128xf32>
    tpu.vector_store %arg6[%c0_108, %c0_109], %205 {strides = array<i32>} : memref<8x128xf32, #tpu.memory_space<vmem>>, vector<8x128xf32>,
    %c5_i32 = arith.constant 5 : i32
    %208 = arith.index_cast %c5_i32 : i32 to index
    %c0_110 = arith.constant 0 : index
    %c0_111 = arith.constant 0 : index
    %209 = vector.load %arg1[%208, %c0_110, %c0_111] : memref<8x8x512xf32, #tpu.memory_space<vmem>>, vector<1x8x512xf32>
    %210 = vector.shape_cast %209 : vector<1x8x512xf32> to vector<8x512xf32>
    %c0_112 = arith.constant 0 : index
    %c0_113 = arith.constant 0 : index
    %211 = vector.load %arg6[%c0_112, %c0_113] : memref<8x128xf32, #tpu.memory_space<vmem>>, vector<8x128xf32>
    %c0_114 = arith.constant 0 : index
    %c0_115 = arith.constant 0 : index
    %212 = vector.load %arg2[%c0_114, %c0_115] : memref<128x512xf32, #tpu.memory_space<vmem>>, vector<128x512xf32>
    %cst_116 = arith.constant dense<0.000000e+00> : vector<8x512xf32>
    %213 = tpu.matmul %211, %212, %cst_116 {dimension_numbers = #tpu.dot_dimension_numbers<[1], [0], [0], [1], [0, 0, 1, 1], [], []>} : vector<8x128xf32>, vector<128x512xf32>, vector<8x512xf32> -> vector<8x512xf32>
    %214 = arith.addf %210, %213 : vector<8x512xf32>
    %215 = vector.extract_strided_slice %214 {offsets = [0, 0], sizes = [8, 128], strides = [1, 1]} : vector<8x512xf32> to vector<8x128xf32>
    %cst_117 = arith.constant 5.000000e-01 : f32
    %216 = vector.broadcast %cst_117 : f32 to vector<8x128xf32>
    %217 = arith.mulf %216, %215 : vector<8x128xf32>
    %218 = math.tanh %217 : vector<8x128xf32>
    %cst_118 = arith.constant 5.000000e-01 : f32
    %219 = vector.broadcast %cst_118 : f32 to vector<8x128xf32>
    %220 = arith.mulf %219, %218 : vector<8x128xf32>
    %cst_119 = arith.constant 5.000000e-01 : f32
    %221 = vector.broadcast %cst_119 : f32 to vector<8x128xf32>
    %222 = arith.addf %220, %221 : vector<8x128xf32>
    %223 = vector.extract_strided_slice %214 {offsets = [0, 128], sizes = [8, 128], strides = [1, 1]} : vector<8x512xf32> to vector<8x128xf32>
    %cst_120 = arith.constant 5.000000e-01 : f32
    %224 = vector.broadcast %cst_120 : f32 to vector<8x128xf32>
    %225 = arith.mulf %224, %223 : vector<8x128xf32>
    %226 = math.tanh %225 : vector<8x128xf32>
    %cst_121 = arith.constant 5.000000e-01 : f32
    %227 = vector.broadcast %cst_121 : f32 to vector<8x128xf32>
    %228 = arith.mulf %227, %226 : vector<8x128xf32>
    %cst_122 = arith.constant 5.000000e-01 : f32
    %229 = vector.broadcast %cst_122 : f32 to vector<8x128xf32>
    %230 = arith.addf %228, %229 : vector<8x128xf32>
    %231 = vector.extract_strided_slice %214 {offsets = [0, 256], sizes = [8, 128], strides = [1, 1]} : vector<8x512xf32> to vector<8x128xf32>
    %232 = math.tanh %231 : vector<8x128xf32>
    %233 = vector.extract_strided_slice %214 {offsets = [0, 384], sizes = [8, 128], strides = [1, 1]} : vector<8x512xf32> to vector<8x128xf32>
    %cst_123 = arith.constant 5.000000e-01 : f32
    %234 = vector.broadcast %cst_123 : f32 to vector<8x128xf32>
    %235 = arith.mulf %234, %233 : vector<8x128xf32>
    %236 = math.tanh %235 : vector<8x128xf32>
    %cst_124 = arith.constant 5.000000e-01 : f32
    %237 = vector.broadcast %cst_124 : f32 to vector<8x128xf32>
    %238 = arith.mulf %237, %236 : vector<8x128xf32>
    %cst_125 = arith.constant 5.000000e-01 : f32
    %239 = vector.broadcast %cst_125 : f32 to vector<8x128xf32>
    %240 = arith.addf %238, %239 : vector<8x128xf32>
    %c0_126 = arith.constant 0 : index
    %c0_127 = arith.constant 0 : index
    %241 = vector.load %arg7[%c0_126, %c0_127] : memref<8x128xf32, #tpu.memory_space<vmem>>, vector<8x128xf32>
    %242 = arith.mulf %230, %241 : vector<8x128xf32>
    %243 = arith.mulf %222, %232 : vector<8x128xf32>
    %244 = arith.addf %242, %243 : vector<8x128xf32>
    %245 = math.tanh %244 : vector<8x128xf32>
    %246 = arith.mulf %240, %245 : vector<8x128xf32>
    %c0_128 = arith.constant 0 : index
    %c0_129 = arith.constant 0 : index
    %247 = vector.load %arg7[%c0_128, %c0_129] : memref<8x128xf32, #tpu.memory_space<vmem>>, vector<8x128xf32>
    tpu.vector_store %arg7[%c0_128, %c0_129], %244 {strides = array<i32>} : memref<8x128xf32, #tpu.memory_space<vmem>>, vector<8x128xf32>,
    %c0_130 = arith.constant 0 : index
    %c0_131 = arith.constant 0 : index
    %248 = vector.load %arg6[%c0_130, %c0_131] : memref<8x128xf32, #tpu.memory_space<vmem>>, vector<8x128xf32>
    tpu.vector_store %arg6[%c0_130, %c0_131], %246 {strides = array<i32>} : memref<8x128xf32, #tpu.memory_space<vmem>>, vector<8x128xf32>,
    %c6_i32 = arith.constant 6 : i32
    %249 = arith.index_cast %c6_i32 : i32 to index
    %c0_132 = arith.constant 0 : index
    %c0_133 = arith.constant 0 : index
    %250 = vector.load %arg1[%249, %c0_132, %c0_133] : memref<8x8x512xf32, #tpu.memory_space<vmem>>, vector<1x8x512xf32>
    %251 = vector.shape_cast %250 : vector<1x8x512xf32> to vector<8x512xf32>
    %c0_134 = arith.constant 0 : index
    %c0_135 = arith.constant 0 : index
    %252 = vector.load %arg6[%c0_134, %c0_135] : memref<8x128xf32, #tpu.memory_space<vmem>>, vector<8x128xf32>
    %c0_136 = arith.constant 0 : index
    %c0_137 = arith.constant 0 : index
    %253 = vector.load %arg2[%c0_136, %c0_137] : memref<128x512xf32, #tpu.memory_space<vmem>>, vector<128x512xf32>
    %cst_138 = arith.constant dense<0.000000e+00> : vector<8x512xf32>
    %254 = tpu.matmul %252, %253, %cst_138 {dimension_numbers = #tpu.dot_dimension_numbers<[1], [0], [0], [1], [0, 0, 1, 1], [], []>} : vector<8x128xf32>, vector<128x512xf32>, vector<8x512xf32> -> vector<8x512xf32>
    %255 = arith.addf %251, %254 : vector<8x512xf32>
    %256 = vector.extract_strided_slice %255 {offsets = [0, 0], sizes = [8, 128], strides = [1, 1]} : vector<8x512xf32> to vector<8x128xf32>
    %cst_139 = arith.constant 5.000000e-01 : f32
    %257 = vector.broadcast %cst_139 : f32 to vector<8x128xf32>
    %258 = arith.mulf %257, %256 : vector<8x128xf32>
    %259 = math.tanh %258 : vector<8x128xf32>
    %cst_140 = arith.constant 5.000000e-01 : f32
    %260 = vector.broadcast %cst_140 : f32 to vector<8x128xf32>
    %261 = arith.mulf %260, %259 : vector<8x128xf32>
    %cst_141 = arith.constant 5.000000e-01 : f32
    %262 = vector.broadcast %cst_141 : f32 to vector<8x128xf32>
    %263 = arith.addf %261, %262 : vector<8x128xf32>
    %264 = vector.extract_strided_slice %255 {offsets = [0, 128], sizes = [8, 128], strides = [1, 1]} : vector<8x512xf32> to vector<8x128xf32>
    %cst_142 = arith.constant 5.000000e-01 : f32
    %265 = vector.broadcast %cst_142 : f32 to vector<8x128xf32>
    %266 = arith.mulf %265, %264 : vector<8x128xf32>
    %267 = math.tanh %266 : vector<8x128xf32>
    %cst_143 = arith.constant 5.000000e-01 : f32
    %268 = vector.broadcast %cst_143 : f32 to vector<8x128xf32>
    %269 = arith.mulf %268, %267 : vector<8x128xf32>
    %cst_144 = arith.constant 5.000000e-01 : f32
    %270 = vector.broadcast %cst_144 : f32 to vector<8x128xf32>
    %271 = arith.addf %269, %270 : vector<8x128xf32>
    %272 = vector.extract_strided_slice %255 {offsets = [0, 256], sizes = [8, 128], strides = [1, 1]} : vector<8x512xf32> to vector<8x128xf32>
    %273 = math.tanh %272 : vector<8x128xf32>
    %274 = vector.extract_strided_slice %255 {offsets = [0, 384], sizes = [8, 128], strides = [1, 1]} : vector<8x512xf32> to vector<8x128xf32>
    %cst_145 = arith.constant 5.000000e-01 : f32
    %275 = vector.broadcast %cst_145 : f32 to vector<8x128xf32>
    %276 = arith.mulf %275, %274 : vector<8x128xf32>
    %277 = math.tanh %276 : vector<8x128xf32>
    %cst_146 = arith.constant 5.000000e-01 : f32
    %278 = vector.broadcast %cst_146 : f32 to vector<8x128xf32>
    %279 = arith.mulf %278, %277 : vector<8x128xf32>
    %cst_147 = arith.constant 5.000000e-01 : f32
    %280 = vector.broadcast %cst_147 : f32 to vector<8x128xf32>
    %281 = arith.addf %279, %280 : vector<8x128xf32>
    %c0_148 = arith.constant 0 : index
    %c0_149 = arith.constant 0 : index
    %282 = vector.load %arg7[%c0_148, %c0_149] : memref<8x128xf32, #tpu.memory_space<vmem>>, vector<8x128xf32>
    %283 = arith.mulf %271, %282 : vector<8x128xf32>
    %284 = arith.mulf %263, %273 : vector<8x128xf32>
    %285 = arith.addf %283, %284 : vector<8x128xf32>
    %286 = math.tanh %285 : vector<8x128xf32>
    %287 = arith.mulf %281, %286 : vector<8x128xf32>
    %c0_150 = arith.constant 0 : index
    %c0_151 = arith.constant 0 : index
    %288 = vector.load %arg7[%c0_150, %c0_151] : memref<8x128xf32, #tpu.memory_space<vmem>>, vector<8x128xf32>
    tpu.vector_store %arg7[%c0_150, %c0_151], %285 {strides = array<i32>} : memref<8x128xf32, #tpu.memory_space<vmem>>, vector<8x128xf32>,
    %c0_152 = arith.constant 0 : index
    %c0_153 = arith.constant 0 : index
    %289 = vector.load %arg6[%c0_152, %c0_153] : memref<8x128xf32, #tpu.memory_space<vmem>>, vector<8x128xf32>
    tpu.vector_store %arg6[%c0_152, %c0_153], %287 {strides = array<i32>} : memref<8x128xf32, #tpu.memory_space<vmem>>, vector<8x128xf32>,
    %c7_i32 = arith.constant 7 : i32
    %290 = arith.index_cast %c7_i32 : i32 to index
    %c0_154 = arith.constant 0 : index
    %c0_155 = arith.constant 0 : index
    %291 = vector.load %arg1[%290, %c0_154, %c0_155] : memref<8x8x512xf32, #tpu.memory_space<vmem>>, vector<1x8x512xf32>
    %292 = vector.shape_cast %291 : vector<1x8x512xf32> to vector<8x512xf32>
    %c0_156 = arith.constant 0 : index
    %c0_157 = arith.constant 0 : index
    %293 = vector.load %arg6[%c0_156, %c0_157] : memref<8x128xf32, #tpu.memory_space<vmem>>, vector<8x128xf32>
    %c0_158 = arith.constant 0 : index
    %c0_159 = arith.constant 0 : index
    %294 = vector.load %arg2[%c0_158, %c0_159] : memref<128x512xf32, #tpu.memory_space<vmem>>, vector<128x512xf32>
    %cst_160 = arith.constant dense<0.000000e+00> : vector<8x512xf32>
    %295 = tpu.matmul %293, %294, %cst_160 {dimension_numbers = #tpu.dot_dimension_numbers<[1], [0], [0], [1], [0, 0, 1, 1], [], []>} : vector<8x128xf32>, vector<128x512xf32>, vector<8x512xf32> -> vector<8x512xf32>
    %296 = arith.addf %292, %295 : vector<8x512xf32>
    %297 = vector.extract_strided_slice %296 {offsets = [0, 0], sizes = [8, 128], strides = [1, 1]} : vector<8x512xf32> to vector<8x128xf32>
    %cst_161 = arith.constant 5.000000e-01 : f32
    %298 = vector.broadcast %cst_161 : f32 to vector<8x128xf32>
    %299 = arith.mulf %298, %297 : vector<8x128xf32>
    %300 = math.tanh %299 : vector<8x128xf32>
    %cst_162 = arith.constant 5.000000e-01 : f32
    %301 = vector.broadcast %cst_162 : f32 to vector<8x128xf32>
    %302 = arith.mulf %301, %300 : vector<8x128xf32>
    %cst_163 = arith.constant 5.000000e-01 : f32
    %303 = vector.broadcast %cst_163 : f32 to vector<8x128xf32>
    %304 = arith.addf %302, %303 : vector<8x128xf32>
    %305 = vector.extract_strided_slice %296 {offsets = [0, 128], sizes = [8, 128], strides = [1, 1]} : vector<8x512xf32> to vector<8x128xf32>
    %cst_164 = arith.constant 5.000000e-01 : f32
    %306 = vector.broadcast %cst_164 : f32 to vector<8x128xf32>
    %307 = arith.mulf %306, %305 : vector<8x128xf32>
    %308 = math.tanh %307 : vector<8x128xf32>
    %cst_165 = arith.constant 5.000000e-01 : f32
    %309 = vector.broadcast %cst_165 : f32 to vector<8x128xf32>
    %310 = arith.mulf %309, %308 : vector<8x128xf32>
    %cst_166 = arith.constant 5.000000e-01 : f32
    %311 = vector.broadcast %cst_166 : f32 to vector<8x128xf32>
    %312 = arith.addf %310, %311 : vector<8x128xf32>
    %313 = vector.extract_strided_slice %296 {offsets = [0, 256], sizes = [8, 128], strides = [1, 1]} : vector<8x512xf32> to vector<8x128xf32>
    %314 = math.tanh %313 : vector<8x128xf32>
    %315 = vector.extract_strided_slice %296 {offsets = [0, 384], sizes = [8, 128], strides = [1, 1]} : vector<8x512xf32> to vector<8x128xf32>
    %cst_167 = arith.constant 5.000000e-01 : f32
    %316 = vector.broadcast %cst_167 : f32 to vector<8x128xf32>
    %317 = arith.mulf %316, %315 : vector<8x128xf32>
    %318 = math.tanh %317 : vector<8x128xf32>
    %cst_168 = arith.constant 5.000000e-01 : f32
    %319 = vector.broadcast %cst_168 : f32 to vector<8x128xf32>
    %320 = arith.mulf %319, %318 : vector<8x128xf32>
    %cst_169 = arith.constant 5.000000e-01 : f32
    %321 = vector.broadcast %cst_169 : f32 to vector<8x128xf32>
    %322 = arith.addf %320, %321 : vector<8x128xf32>
    %c0_170 = arith.constant 0 : index
    %c0_171 = arith.constant 0 : index
    %323 = vector.load %arg7[%c0_170, %c0_171] : memref<8x128xf32, #tpu.memory_space<vmem>>, vector<8x128xf32>
    %324 = arith.mulf %312, %323 : vector<8x128xf32>
    %325 = arith.mulf %304, %314 : vector<8x128xf32>
    %326 = arith.addf %324, %325 : vector<8x128xf32>
    %327 = math.tanh %326 : vector<8x128xf32>
    %328 = arith.mulf %322, %327 : vector<8x128xf32>
    %c0_172 = arith.constant 0 : index
    %c0_173 = arith.constant 0 : index
    %329 = vector.load %arg7[%c0_172, %c0_173] : memref<8x128xf32, #tpu.memory_space<vmem>>, vector<8x128xf32>
    tpu.vector_store %arg7[%c0_172, %c0_173], %326 {strides = array<i32>} : memref<8x128xf32, #tpu.memory_space<vmem>>, vector<8x128xf32>,
    %c0_174 = arith.constant 0 : index
    %c0_175 = arith.constant 0 : index
    %330 = vector.load %arg6[%c0_174, %c0_175] : memref<8x128xf32, #tpu.memory_space<vmem>>, vector<8x128xf32>
    tpu.vector_store %arg6[%c0_174, %c0_175], %328 {strides = array<i32>} : memref<8x128xf32, #tpu.memory_space<vmem>>, vector<8x128xf32>,
    %c8_i32 = arith.constant 8 : i32
    %c0_i32_176 = arith.constant 0 : i32
    %331 = arith.cmpi eq, %arg0, %c0_i32_176 : i32
    %332 = arith.extui %331 : i1 to i32
    %c0_i32_177 = arith.constant 0 : i32
    %333 = arith.cmpi ne, %332, %c0_i32_177 : i32
    scf.if %333 {
      %c0_178 = arith.constant 0 : index
      %c0_179 = arith.constant 0 : index
      %334 = vector.load %arg6[%c0_178, %c0_179] : memref<8x128xf32, #tpu.memory_space<vmem>>, vector<8x128xf32>
      %c0_180 = arith.constant 0 : index
      %c0_181 = arith.constant 0 : index
      %335 = vector.load %arg3[%c0_180, %c0_181] : memref<128x128xf32, #tpu.memory_space<vmem>>, vector<128x128xf32>
      %cst_182 = arith.constant dense<0.000000e+00> : vector<8x128xf32>
      %336 = tpu.matmul %334, %335, %cst_182 {dimension_numbers = #tpu.dot_dimension_numbers<[1], [0], [0], [1], [0, 0, 1, 1], [], []>} : vector<8x128xf32>, vector<128x128xf32>, vector<8x128xf32> -> vector<8x128xf32>
      %c0_183 = arith.constant 0 : index
      %c0_184 = arith.constant 0 : index
      %337 = vector.load %arg4[%c0_183, %c0_184] : memref<1x128xf32, #tpu.memory_space<vmem>>, vector<1x128xf32>
      %338 = vector.broadcast %337 : vector<1x128xf32> to vector<8x128xf32>
      %339 = arith.addf %336, %338 : vector<8x128xf32>
      %c0_185 = arith.constant 0 : index
      %c0_186 = arith.constant 0 : index
      %340 = vector.load %arg5[%c0_185, %c0_186] : memref<8x128xf32, #tpu.memory_space<vmem>>, vector<8x128xf32>
      tpu.vector_store %arg5[%c0_185, %c0_186], %339 {strides = array<i32>} : memref<8x128xf32, #tpu.memory_space<vmem>>, vector<8x128xf32>,
    } else {
    }
    return
  }
  func.func @transform_0(%arg0: i32) -> (i32, i32, i32) {
    %c0_i32 = arith.constant 0 : i32
    %c0_i32_0 = arith.constant 0 : i32
    %c0_i32_1 = arith.constant 0 : i32
    return %arg0, %c0_i32, %c0_i32_0 : i32, i32, i32
  }
  func.func @transform_1(%arg0: i32) -> (i32, i32) {
    %c0_i32 = arith.constant 0 : i32
    %c0_i32_0 = arith.constant 0 : i32
    %c0_i32_1 = arith.constant 0 : i32
    return %c0_i32, %c0_i32_0 : i32, i32
  }
  func.func @transform_2(%arg0: i32) -> (i32, i32) {
    %c0_i32 = arith.constant 0 : i32
    %c0_i32_0 = arith.constant 0 : i32
    %c0_i32_1 = arith.constant 0 : i32
    return %c0_i32, %c0_i32_0 : i32, i32
  }
  func.func @transform_3(%arg0: i32) -> (i32, i32) {
    %c0_i32 = arith.constant 0 : i32
    %c0_i32_0 = arith.constant 0 : i32
    %c0_i32_1 = arith.constant 0 : i32
    return %c0_i32, %c0_i32_0 : i32, i32
  }
  func.func @transform_4(%arg0: i32) -> (i32, i32) {
    %c0_i32 = arith.constant 0 : i32
    %c0_i32_0 = arith.constant 0 : i32
    %c0_i32_1 = arith.constant 0 : i32
    return %c0_i32, %c0_i32_0 : i32, i32
  }
}

</mosaic_0001>

<bundles_post_ra>
// kernel: tpu_custom_call.1
= control target key start
LH: loop header
LB: loop body
LE: loop exit
PB: predicated region body
PF: predicated region fallthrough
CT: control target
= control target key end

     0   :  { %9 = vsyncpa [#allocation5], 0  ;;  %s3184_s0 = inlined_call_operand.hbm [shape: f32[8,8,512], index: 0, kind: input, shape index: {}]   ;;  %s3185_s1 = inlined_call_operand.hbm [shape: f32[128,512], index: 1, kind: input, shape index: {}]   ;;  %s3186_s2 = inlined_call_operand.hbm [shape: f32[128,128], index: 2, kind: input, shape index: {}]   ;;  %s3187_s3 = inlined_call_operand.vmem [shape: f32[1,128], index: 3, kind: input, shape index: {}]   ;;  %s3188_s4 = inlined_call_operand.hbm [shape: f32[8,128], index: 4, kind: output, shape index: {}]  }
   0x1   :  { %10 = vsyncpa [#allocation8], 0 }
   0x2   :  { %11 = vsyncpa [#allocation6], 0  ;;  %s2303_s15 = smov [#allocation7]   ;;  %s2304_s17 = smov [#allocation4]  }
   0x3   :  { %s29_s16 = sshll.u32 %s2303_s15, 4  ;;  %s17_s18 = sshll.u32 %s2304_s17, 4  ;;  %s30_s16 = int_to_ptr.vmem [resolvable:$true] %s29_s16  ;;  %s18_s18 = int_to_ptr.vmem [resolvable:$true] %s17_s18 }
   0x4   :  { %s2225_s19 = scalar_lea.vmem %s30_s16, 8192  ;;  %p2230_p1 = scmp.lt.s32.totalorder %s30_s16, %s30_s16 }
   0x5   :  { %p2226_p0 = scmp.ne.s32.totalorder %s30_s16, %s2225_s19  ;;  %p2231_p2 = scmp.lt.s32.totalorder %s2225_s19, %s2225_s19 }
   0x7   :  { %p2232_p3 = por %p2231_p2, %p2230_p1 }
   0x9   :  { %p2233_p4 = pnand %p2232_p3, %p2226_p0 }
   0xb   :  { %2236 = shalt.err (!%p2233_p4)
}
   0xc   :  { %s2305_s20 = smov 512   ;;  %s2306_s21 = smov 32  }
   0xd   :  { %35 = dma.hbm_to_vmem [thread:$0]  %s3185_s1, 8192, %s30_s16, [#allocation8], %s2305_s20, %s2305_s20, %s2306_s21  }
   0xe   :  { %s2245_s24 = scalar_lea.vmem %s18_s18, 4096  ;;  %p2250_p6 = scmp.lt.s32.totalorder %s18_s18, %s18_s18 }
   0xf   :  { %p2246_p5 = scmp.ne.s32.totalorder %s18_s18, %s2245_s24  ;;  %p2251_p7 = scmp.lt.s32.totalorder %s2245_s24, %s2245_s24 }
  0x11   :  { %p2252_p8 = por %p2251_p7, %p2250_p6 }
  0x13   :  { %p2253_p9 = pnand %p2252_p8, %p2246_p5 }
  0x15   :  { %2256 = shalt.err (!%p2253_p9)
}
  0x16   :  { %23 = dma.hbm_to_vmem [thread:$0]  %s3184_s0, 4096, %s18_s18, [#allocation5], %s2305_s20, %s2305_s20, %s2306_s21  }
  0x17   :  { %s2307_s27 = smov [#allocation9]  }
  0x18   :  { %s41_s28 = sshll.u32 %s2307_s27, 4  ;;  %s42_s28 = int_to_ptr.vmem [resolvable:$true] %s41_s28 }
  0x19   :  { %s2265_s29 = scalar_lea.vmem %s42_s28, 2048  ;;  %p2270_p11 = scmp.lt.s32.totalorder %s42_s28, %s42_s28 }
  0x1a   :  { %p2266_p10 = scmp.ne.s32.totalorder %s42_s28, %s2265_s29  ;;  %p2271_p12 = scmp.lt.s32.totalorder %s2265_s29, %s2265_s29 }
  0x1c   :  { %p2272_p13 = por %p2271_p12, %p2270_p11 }
  0x1e   :  { %p2273_p0 = pnand %p2272_p13, %p2266_p10 }
  0x20   :  { %2276 = shalt.err (!%p2273_p0)
}
  0x21   :  { %s2308_s1 = smov 128   ;;  %s2309_s30 = smov 8  }
  0x22   :  { %47 = dma.hbm_to_vmem [thread:$0]  %s3186_s2, 2048, %s42_s28, [#allocation8], %s2308_s1, %s2308_s1, %s2309_s30  }
  0x23   :  { %2297 = dma.done.wait [#allocation5], 4096  }
  0x24   :  { %2298 = vsyncadd [#allocation5], 4294963200 }
  0x25   :  { %2299 = dma.done.wait [#allocation8], 10240  }
  0x26   :  { %2300 = vsyncadd [#allocation8], 4294957056  ;;  %v3189_v0 = vmov 0.0   ;;  %v2349_v1 = vld [vmem:[#allocation7 + $0x1e8] sm:$0xff]  ;;  %v2351_v2 = vld [vmem:[#allocation7 + $0x1e0] sm:$0xff]  ;;  %vm2311_vm0 = vmmov 0  }
  0x27   :  { %198 = vmatprep.mubr.f32.mxu0 %v3189_v0  ;;  %269 = vmatprep.mubr.f32.mxu1 %v3189_v0  ;;  %3278 = vst [vmem:[#allocation14_spill] sm:$0xff] %v2349_v1  ;;  %v2353_v3 = vld [vmem:[#allocation7 + $0x1c8] sm:$0xff]  ;;  %v2356_v4 = vld [vmem:[#allocation7 + $0x1c0] sm:$0xff]  ;;  %v2361_v6 = vld [vmem:[#allocation7 + $0x1f8] sm:$0xff]  ;;  %s2312_s7 = smov [#allocation10]  }
  0x28   :  { %134 = vmatprep.subr.mxu0 %v2349_v1  ;;  %v2359_v5 = vld [vmem:[#allocation7 + $0x1a8] sm:$0xff]  ;;  %3279 = vst [vmem:[#allocation15_spill] sm:$0xff] %v2361_v6  ;;  %v2364_v7 = vld [vmem:[#allocation7 + $0x1a0] sm:$0xff]  ;;  %205 = vmatprep.subr.mxu1 %v2361_v6  ;;  %v2367_v8 = vld [vmem:[#allocation7 + $0x1f0] sm:$0xff]  ;;  %s2064_s8 = sshll.u32 %s2312_s7, 4  ;;  %s2065_s8 = int_to_ptr.vmem [resolvable:$true] %s2064_s8 }
  0x29   :  { %135 = vmatpush1.msra.mxu0 %v2351_v2  ;;  %v2369_v9 = vld [vmem:[#allocation7 + $0x1d8] sm:$0xff]  ;;  %v2372_v10 = vld [vmem:[#allocation7 + $0x188] sm:$0xff]  ;;  %206 = vmatpush1.msra.mxu1 %v2367_v8  ;;  %v2375_v11 = vld [vmem:[#allocation7 + $0x1d0] sm:$0xff]  ;;  %s2277_s9 = scalar_lea.vmem %s2065_s8, 128  ;;  %p2282_p2 = scmp.lt.s32.totalorder %s2065_s8, %s2065_s8 }
  0x2a   :  { %136 = vmatprep.subr.mxu0 %v2353_v3  ;;  %v2378_v12 = vld [vmem:[#allocation7 + $0x180] sm:$0xff]  ;;  %207 = vmatprep.subr.mxu1 %v2369_v9  ;;  %v2381_v13 = vld [vmem:[#allocation7 + $0x1b8] sm:$0xff]  ;;  %v2383_v14 = vld [vmem:[#allocation7 + $0x1b0] sm:$0xff]  ;;  %p2278_p1 = scmp.ne.s32.totalorder %s2065_s8, %s2277_s9  ;;  %p2283_p3 = scmp.lt.s32.totalorder %s2277_s9, %s2277_s9 }
  0x2b   :  { %137 = vmatpush1.msra.mxu0 %v2356_v4  ;;  %v2386_v15 = vld [vmem:[#allocation7 + $0x168] sm:$0xff]  ;;  %208 = vmatpush1.msra.mxu1 %v2375_v11  ;;  %v2389_v16 = vld [vmem:[#allocation7 + $0x198] sm:$0xff]  ;;  %v2392_v17 = vld [vmem:[#allocation7 + $0x160] sm:$0xff] }
  0x2c   :  { %138 = vmatprep.subr.mxu0 %v2359_v5  ;;  %209 = vmatprep.subr.mxu1 %v2381_v13  ;;  %v2395_v18 = vld [vmem:[#allocation7 + $0x190] sm:$0xff]  ;;  %v2398_v19 = vld [vmem:[#allocation7 + $0x148] sm:$0xff]  ;;  %v2401_v20 = vld [vmem:[#allocation7 + $0x178] sm:$0xff]  ;;  %p2284_p4 = por %p2283_p3, %p2282_p2 }
  0x2d   :  { %139 = vmatpush1.msra.mxu0 %v2364_v7  ;;  %210 = vmatpush1.msra.mxu1 %v2383_v14  ;;  %v2404_v21 = vld [vmem:[#allocation7 + $0x140] sm:$0xff]  ;;  %v2407_v22 = vld [vmem:[#allocation7 + $0x170] sm:$0xff]  ;;  %v2410_v23 = vld [vmem:[#allocation7 + $0x128] sm:$0xff] }
  0x2e   :  { %140 = vmatprep.subr.mxu0 %v2372_v10  ;;  %211 = vmatprep.subr.mxu1 %v2389_v16  ;;  %v2413_v24 = vld [vmem:[#allocation7 + $0x158] sm:$0xff]  ;;  %v2416_v25 = vld [vmem:[#allocation7 + $0x120] sm:$0xff]  ;;  %v2419_v26 = vld [vmem:[#allocation7 + $0x150] sm:$0xff]  ;;  %p2285_p5 = pnand %p2284_p4, %p2278_p1 }
  0x2f   :  { %141 = vmatpush1.msra.mxu0 %v2378_v12  ;;  %212 = vmatpush1.msra.mxu1 %v2395_v18  ;;  %v2422_v27 = vld [vmem:[#allocation7 + $0x108] sm:$0xff]  ;;  %v2425_v28 = vld [vmem:[#allocation7 + $0x138] sm:$0xff]  ;;  %v2428_v29 = vld [vmem:[#allocation7 + $0x100] sm:$0xff] }
  0x30   :  { %142 = vmatprep.subr.mxu0 %v2386_v15  ;;  %213 = vmatprep.subr.mxu1 %v2401_v20  ;;  %v2431_v30 = vld [vmem:[#allocation7 + $0x130] sm:$0xff]  ;;  %v2434_v31 = vld [vmem:[#allocation7 + $0xe8] sm:$0xff]  ;;  %v2437_v32 = vld [vmem:[#allocation7 + $0x118] sm:$0xff] }
  0x31   :  { %143 = vmatpush1.msra.mxu0 %v2392_v17  ;;  %214 = vmatpush1.msra.mxu1 %v2407_v22  ;;  %v2440_v33 = vld [vmem:[#allocation7 + $0xe0] sm:$0xff]  ;;  %v2443_v34 = vld [vmem:[#allocation7 + $0x110] sm:$0xff]  ;;  %v2446_v35 = vld [vmem:[#allocation7 + $0xc8] sm:$0xff] }
  0x32   :  { %144 = vmatprep.subr.mxu0 %v2398_v19  ;;  %215 = vmatprep.subr.mxu1 %v2413_v24  ;;  %v2449_v36 = vld [vmem:[#allocation7 + $0xf8] sm:$0xff]  ;;  %v2452_v37 = vld [vmem:[#allocation7 + $0xc0] sm:$0xff]  ;;  %v2455_v38 = vld [vmem:[#allocation7 + $0xf0] sm:$0xff] }
  0x33   :  { %145 = vmatpush1.msra.mxu0 %v2404_v21  ;;  %216 = vmatpush1.msra.mxu1 %v2419_v26  ;;  %v2458_v39 = vld [vmem:[#allocation7 + $0xa8] sm:$0xff]  ;;  %v2461_v40 = vld [vmem:[#allocation7 + $0xd8] sm:$0xff]  ;;  %v2464_v41 = vld [vmem:[#allocation7 + $0xa0] sm:$0xff] }
  0x34   :  { %146 = vmatprep.subr.mxu0 %v2410_v23  ;;  %217 = vmatprep.subr.mxu1 %v2425_v28  ;;  %v2467_v42 = vld [vmem:[#allocation7 + $0xd0] sm:$0xff]  ;;  %v2470_v43 = vld [vmem:[#allocation7 + $0x88] sm:$0xff]  ;;  %v2473_v44 = vld [vmem:[#allocation7 + $0xb8] sm:$0xff] }
  0x35   :  { %147 = vmatpush1.msra.mxu0 %v2416_v25  ;;  %218 = vmatpush1.msra.mxu1 %v2431_v30  ;;  %v2476_v45 = vld [vmem:[#allocation7 + $0x80] sm:$0xff]  ;;  %v2479_v46 = vld [vmem:[#allocation7 + $0xb0] sm:$0xff]  ;;  %v2482_v47 = vld [vmem:[#allocation7 + $0x68] sm:$0xff] }
  0x36   :  { %148 = vmatprep.subr.mxu0 %v2422_v27  ;;  %219 = vmatprep.subr.mxu1 %v2437_v32  ;;  %3280 = vst [vmem:[#allocation16_spill] sm:$0xff] %v2476_v45  ;;  %3281 = vst [vmem:[#allocation17_spill] sm:$0xff] %v2482_v47  ;;  %v2485_v48 = vld [vmem:[#allocation7 + $0x98] sm:$0xff]  ;;  %v2488_v49 = vld [vmem:[#allocation7 + $0x60] sm:$0xff] }
  0x37   :  { %149 = vmatpush1.msra.mxu0 %v2428_v29  ;;  %220 = vmatpush1.msra.mxu1 %v2443_v34  ;;  %3282 = vst [vmem:[#allocation18_spill] sm:$0xff] %v2485_v48  ;;  %3283 = vst [vmem:[#allocation19_spill] sm:$0xff] %v2488_v49  ;;  %v2491_v50 = vld [vmem:[#allocation7 + $0x90] sm:$0xff]  ;;  %v2494_v51 = vld [vmem:[#allocation7 + $0x48] sm:$0xff] }
  0x38   :  { %150 = vmatprep.subr.mxu0 %v2434_v31  ;;  %221 = vmatprep.subr.mxu1 %v2449_v36  ;;  %3284 = vst [vmem:[#allocation20_spill] sm:$0xff] %v2491_v50  ;;  %3285 = vst [vmem:[#allocation21_spill] sm:$0xff] %v2494_v51  ;;  %v2497_v52 = vld [vmem:[#allocation7 + $0x78] sm:$0xff]  ;;  %v2500_v53 = vld [vmem:[#allocation7 + $0x40] sm:$0xff] }
  0x39   :  { %151 = vmatpush1.msra.mxu0 %v2440_v33  ;;  %222 = vmatpush1.msra.mxu1 %v2455_v38  ;;  %3286 = vst [vmem:[#allocation22_spill] sm:$0xff] %v2497_v52  ;;  %3287 = vst [vmem:[#allocation23_spill] sm:$0xff] %v2500_v53  ;;  %v2503_v54 = vld [vmem:[#allocation7 + $0x70] sm:$0xff]  ;;  %v2506_v55 = vld [vmem:[#allocation7 + $0x28] sm:$0xff] }
  0x3a   :  { %152 = vmatprep.subr.mxu0 %v2446_v35  ;;  %223 = vmatprep.subr.mxu1 %v2461_v40  ;;  %3288 = vst [vmem:[#allocation24_spill] sm:$0xff] %v2503_v54  ;;  %3289 = vst [vmem:[#allocation25_spill] sm:$0xff] %v2506_v55  ;;  %v2509_v56 = vld [vmem:[#allocation7 + $0x58] sm:$0xff]  ;;  %v2512_v57 = vld [vmem:[#allocation7 + $0x20] sm:$0xff] }
  0x3b   :  { %153 = vmatpush1.msra.mxu0 %v2452_v37  ;;  %224 = vmatpush1.msra.mxu1 %v2467_v42  ;;  %3290 = vst [vmem:[#allocation26_spill] sm:$0xff] %v2509_v56  ;;  %3291 = vst [vmem:[#allocation27_spill] sm:$0xff] %v2512_v57  ;;  %v2515_v58 = vld [vmem:[#allocation7 + $0x50] sm:$0xff]  ;;  %v2518_v59 = vld [vmem:[#allocation7 + $0x8] sm:$0xff] }
  0x3c   :  { %154 = vmatprep.subr.mxu0 %v2458_v39  ;;  %225 = vmatprep.subr.mxu1 %v2473_v44  ;;  %3292 = vst [vmem:[#allocation28_spill] sm:$0xff] %v2515_v58  ;;  %3293 = vst [vmem:[#allocation29_spill] sm:$0xff] %v2518_v59  ;;  %v2521_v60 = vld [vmem:[#allocation7 + $0x38] sm:$0xff]  ;;  %v2524_v61 = vld [vmem:[#allocation7] sm:$0xff] }
  0x3d   :  { %155 = vmatpush1.msra.mxu0 %v2464_v41  ;;  %226 = vmatpush1.msra.mxu1 %v2479_v46  ;;  %3294 = vst [vmem:[#allocation30_spill] sm:$0xff] %v2521_v60  ;;  %3295 = vst [vmem:[#allocation31_spill] sm:$0xff] %v2524_v61  ;;  %v2527_v62 = vld [vmem:[#allocation7 + $0x30] sm:$0xff]  ;;  %v2531_v63 = vld [vmem:[#allocation7 + $0x18] sm:$0xff] }
  0x3e   :  { %156 = vmatprep.subr.mxu0 %v2470_v43  ;;  %227 = vmatprep.subr.mxu1 %v2485_v48  ;;  %3296 = vst [vmem:[#allocation32_spill] sm:$0xff] %v2527_v62  ;;  %3297 = vst [vmem:[#allocation33_spill] sm:$0xff] %v2531_v63  ;;  %v2535_v0 = vld [vmem:[#allocation7 + $0x10] sm:$0xff] }
  0x3f   :  { %157 = vmatpush1.msra.mxu0 %v2476_v45  ;;  %228 = vmatpush1.msra.mxu1 %v2491_v50  ;;  %3298 = vst [vmem:[#allocation34_spill] sm:$0xff] %v2535_v0 }
  0x40   :  { %158 = vmatprep.subr.mxu0 %v2482_v47  ;;  %229 = vmatprep.subr.mxu1 %v2497_v52 }
  0x41   :  { %159 = vmatpush1.msra.mxu0 %v2488_v49  ;;  %230 = vmatpush1.msra.mxu1 %v2503_v54 }
  0x42   :  { %160 = vmatprep.subr.mxu0 %v2494_v51  ;;  %231 = vmatprep.subr.mxu1 %v2509_v56 }
  0x43   :  { %161 = vmatpush1.msra.mxu0 %v2500_v53  ;;  %232 = vmatpush1.msra.mxu1 %v2515_v58 }
  0x44   :  { %162 = vmatprep.subr.mxu0 %v2506_v55  ;;  %233 = vmatprep.subr.mxu1 %v2521_v60  ;;  %v3299_v55 = vmov 0.0  }
  0x45   :  { %163 = vmatpush1.msra.mxu0 %v2512_v57  ;;  %234 = vmatpush1.msra.mxu1 %v2527_v62 }
  0x46   :  { %164 = vmatprep.subr.mxu0 %v2518_v59  ;;  %235 = vmatprep.subr.mxu1 %v2531_v63 }
  0x47   :  { %165 = vmatpush1.msra.mxu0 %v2524_v61  ;;  %236 = vmatpush1.msra.mxu1 %v2535_v0 }
  0x48   :  { %199 = vmatmul.mubr.f32.vlgmr.msra.gmra.mxu0 %v3299_v55  ;;  %371 = vmatprep.subr.mxu0 %v2349_v1 }
  0x49   :  { %270 = vmatmul.mubr.f32.vlgmr.msra.gmra.mxu1 %v3299_v55  ;;  %442 = vmatprep.subr.mxu1 %v2361_v6 }
  0x4a   :  { %372 = vmatpush1.msra.mxu0 %v2351_v2  ;;  %443 = vmatpush1.msra.mxu1 %v2367_v8 }
  0x4b   :  { %373 = vmatprep.subr.mxu0 %v2353_v3  ;;  %444 = vmatprep.subr.mxu1 %v2369_v9 }
  0x4c   :  { %374 = vmatpush1.msra.mxu0 %v2356_v4  ;;  %445 = vmatpush1.msra.mxu1 %v2375_v11 }
  0x4d   :  { %375 = vmatprep.subr.mxu0 %v2359_v5  ;;  %446 = vmatprep.subr.mxu1 %v2381_v13 }
  0x4e   :  { %376 = vmatpush1.msra.mxu0 %v2364_v7  ;;  %447 = vmatpush1.msra.mxu1 %v2383_v14 }
  0x4f   :  { %377 = vmatprep.subr.mxu0 %v2372_v10  ;;  %448 = vmatprep.subr.mxu1 %v2389_v16 }
  0x50   :  { %378 = vmatpush1.msra.mxu0 %v2378_v12  ;;  %449 = vmatpush1.msra.mxu1 %v2395_v18 }
  0x51   :  { %379 = vmatprep.subr.mxu0 %v2386_v15  ;;  %450 = vmatprep.subr.mxu1 %v2401_v20 }
  0x52   :  { %380 = vmatpush1.msra.mxu0 %v2392_v17  ;;  %451 = vmatpush1.msra.mxu1 %v2407_v22 }
  0x53   :  { %381 = vmatprep.subr.mxu0 %v2398_v19  ;;  %452 = vmatprep.subr.mxu1 %v2413_v24 }
  0x54   :  { %382 = vmatpush1.msra.mxu0 %v2404_v21  ;;  %453 = vmatpush1.msra.mxu1 %v2419_v26 }
  0x55   :  { %383 = vmatprep.subr.mxu0 %v2410_v23  ;;  %454 = vmatprep.subr.mxu1 %v2425_v28 }
  0x56   :  { %384 = vmatpush1.msra.mxu0 %v2416_v25  ;;  %455 = vmatpush1.msra.mxu1 %v2431_v30 }
  0x57   :  { %385 = vmatprep.subr.mxu0 %v2422_v27  ;;  %456 = vmatprep.subr.mxu1 %v2437_v32 }
  0x58   :  { %386 = vmatpush1.msra.mxu0 %v2428_v29  ;;  %457 = vmatpush1.msra.mxu1 %v2443_v34 }
  0x59   :  { %387 = vmatprep.subr.mxu0 %v2434_v31  ;;  %458 = vmatprep.subr.mxu1 %v2449_v36 }
  0x5a   :  { %388 = vmatpush1.msra.mxu0 %v2440_v33  ;;  %459 = vmatpush1.msra.mxu1 %v2455_v38 }
  0x5b   :  { %389 = vmatprep.subr.mxu0 %v2446_v35  ;;  %460 = vmatprep.subr.mxu1 %v2461_v40 }
  0x5c   :  { %390 = vmatpush1.msra.mxu0 %v2452_v37  ;;  %461 = vmatpush1.msra.mxu1 %v2467_v42 }
  0x5d   :  { %391 = vmatprep.subr.mxu0 %v2458_v39  ;;  %462 = vmatprep.subr.mxu1 %v2473_v44 }
  0x5e   :  { %392 = vmatpush1.msra.mxu0 %v2464_v41  ;;  %463 = vmatpush1.msra.mxu1 %v2479_v46 }
  0x5f   :  { %393 = vmatprep.subr.mxu0 %v2470_v43  ;;  %464 = vmatprep.subr.mxu1 %v2485_v48  ;;  %v3300_v48 = vld [vmem:[#allocation25_spill] sm:$0xff] }
  0x60   :  { %394 = vmatpush1.msra.mxu0 %v2476_v45  ;;  %465 = vmatpush1.msra.mxu1 %v2491_v50 }
  0x61   :  { %395 = vmatprep.subr.mxu0 %v2482_v47  ;;  %466 = vmatprep.subr.mxu1 %v2497_v52 }
  0x62   :  { %396 = vmatpush1.msra.mxu0 %v2488_v49  ;;  %467 = vmatpush1.msra.mxu1 %v2503_v54 }
  0x63   :  { %397 = vmatprep.subr.mxu0 %v2494_v51  ;;  %468 = vmatprep.subr.mxu1 %v2509_v56 }
  0x64   :  { %398 = vmatpush1.msra.mxu0 %v2500_v53  ;;  %469 = vmatpush1.msra.mxu1 %v2515_v58 }
  0x65   :  { %399 = vmatprep.subr.mxu0 %v3300_v48  ;;  %470 = vmatprep.subr.mxu1 %v2521_v60  ;;  %v65_v60 = vld [vmem:[#allocation4] sm:$0xff]  ;;  %v66_v48 = vld [vmem:[#allocation4 + $0x8] sm:$0xff] }
  0x66   :  { %400 = vmatpush1.msra.mxu0 %v2512_v57  ;;  %471 = vmatpush1.msra.mxu1 %v2527_v62 }
  0x67   :  { %401 = vmatprep.subr.mxu0 %v2518_v59  ;;  %472 = vmatprep.subr.mxu1 %v2531_v63  ;;  %v67_v59 = vld [vmem:[#allocation4 + $0x10] sm:$0xff] }
  0x68   :  { %402 = vmatpush1.msra.mxu0 %v2524_v61  ;;  %435 = vmatprep.mubr.f32.mxu0 %v3299_v55 }
  0x69   :  { %473 = vmatpush1.msra.mxu1 %v2535_v0  ;;  %506 = vmatprep.mubr.f32.mxu1 %v3299_v55  ;;  %v68_v0 = vld [vmem:[#allocation4 + $0x18] sm:$0xff] }
  0x6a   :  { %608 = vmatprep.subr.mxu0 %v2349_v1  ;;  %679 = vmatprep.subr.mxu1 %v2361_v6 }
 0x108   :  { %v200_v57 = vpop.f32.mrf.mxu0 }
 0x109   :  { %v276_v62 = vadd.f32 %v200_v57, %v65_v60  ;;  %v271_v53 = vpop.f32.mrf.mxu1 }
 0x10a   :  { %v202_v58 = vpop.f32.mrf.mxu0  ;;  %v278_v51 = vadd.f32 %v271_v53, %v67_v59  ;;  %v3310_v59 = vld [vmem:[#allocation23_spill] sm:$0xff] }
 0x10b   :  { %v280_v63 = vmul.f32 0.5, %v276_v62  ;;  %v277_v56 = vadd.f32 %v202_v58, %v66_v48  ;;  %v273_v55 = vpop.f32.mrf.mxu1 }
 0x10c   :  { %v279_v54 = vadd.f32 %v273_v55, %v68_v0  ;;  %v3309_v55 = vld [vmem:[#allocation26_spill] sm:$0xff] }
 0x10d   :  { %2137 = vtanh.f32 %v280_v63  ;;  %v284_v61 = vmul.f32 0.5, %v277_v56  ;;  %v3312_v63 = vld [vmem:[#allocation25_spill] sm:$0xff] }
 0x10e   :  { %v289_v1 = vmul.f32 0.5, %v279_v54  ;;  %v3308_v54 = vld [vmem:[#allocation21_spill] sm:$0xff] }
 0x10f   :  { %2139 = vtanh.f32 %v284_v61  ;;  %v3311_v61 = vld [vmem:[#allocation28_spill] sm:$0xff] }
 0x110   :  { %2141 = vtanh.f32 %v278_v51 }
 0x111   :  { %2143 = vtanh.f32 %v289_v1  ;;  %v3301_v1 = vld [vmem:[#allocation18_spill] sm:$0xff] }
 0x11a   :  { %v2138_v49 = vpop.eup %2137 }
 0x11b   :  { %v282_v6 = vmul.f32 0.5, %v2138_v49  ;;  %v3305_v49 = vld [vmem:[#allocation22_spill] sm:$0xff] }
 0x11c   :  { %v2140_v52 = vpop.eup %2139 }
 0x11d   :  { %v283_v47 = vadd.f32 0.5, %v282_v6  ;;  %v286_v50 = vmul.f32 0.5, %v2140_v52  ;;  %v2142_v57 = vpop.eup %2141  ;;  %v3302_v6 = vld [vmem:[#allocation16_spill] sm:$0xff] }
 0x11e   :  { %v2144_v53 = vpop.eup %2143  ;;  %v3307_v52 = vld [vmem:[#allocation24_spill] sm:$0xff] }
 0x11f   :  { %v287_v60 = vadd.f32 0.5, %v286_v50  ;;  %v295_v62 = vmul.f32 %v2142_v57, %v283_v47  ;;  %v291_v51 = vmul.f32 0.5, %v2144_v53  ;;  %v3304_v47 = vld [vmem:[#allocation17_spill] sm:$0xff]  ;;  %v3306_v50 = vld [vmem:[#allocation19_spill] sm:$0xff]  ;;  %v3313_v57 = vld [vmem:[#allocation30_spill] sm:$0xff] }
 0x120   :  { %v3316_v53 = vld [vmem:[#allocation29_spill] sm:$0xff] }
 0x121   :  { %v294_v45 = vmul.f32 0.0, %v287_v60  ;;  %v292_v56 = vadd.f32 0.5, %v291_v51  ;;  %v3314_v60 = vld [vmem:[#allocation27_spill] sm:$0xff]  ;;  %v3317_v51 = vld [vmem:[#allocation33_spill] sm:$0xff] }
 0x123   :  { %v2611_v48 = vadd.f32 %v295_v62, %v294_v45  ;;  %v3303_v45 = vld [vmem:[#allocation20_spill] sm:$0xff] }
 0x124   :  { %v3315_v62 = vld [vmem:[#allocation32_spill] sm:$0xff] }
 0x125   :  { %2145 = vtanh.f32 %v2611_v48 }
 0x132   :  { %v2146_v58 = vpop.eup %2145 }
 0x133   :  { %v298_v0 = vmul.f32 %v2146_v58, %v292_v56  ;;  %v3318_v56 = vld [vmem:[#allocation31_spill] sm:$0xff]  ;;  %v3319_v58 = vmov 0.0  }
 0x135   :  { %436 = vmatmul.mubr.f32.vlgmr.msra.gmra.mxu0 %v298_v0  ;;  %507 = vmatmul.mubr.f32.vlgmr.msra.gmra.mxu1 %v298_v0  ;;  %v3320_v0 = vld [vmem:[#allocation34_spill] sm:$0xff] }
 0x136   :  { %609 = vmatpush1.msra.mxu0 %v2351_v2  ;;  %680 = vmatpush1.msra.mxu1 %v2367_v8 }
 0x137   :  { %610 = vmatprep.subr.mxu0 %v2353_v3  ;;  %681 = vmatprep.subr.mxu1 %v2369_v9 }
 0x138   :  { %611 = vmatpush1.msra.mxu0 %v2356_v4  ;;  %682 = vmatpush1.msra.mxu1 %v2375_v11 }
 0x139   :  { %612 = vmatprep.subr.mxu0 %v2359_v5  ;;  %683 = vmatprep.subr.mxu1 %v2381_v13 }
 0x13a   :  { %613 = vmatpush1.msra.mxu0 %v2364_v7  ;;  %684 = vmatpush1.msra.mxu1 %v2383_v14 }
 0x13b   :  { %614 = vmatprep.subr.mxu0 %v2372_v10  ;;  %685 = vmatprep.subr.mxu1 %v2389_v16 }
 0x13c   :  { %615 = vmatpush1.msra.mxu0 %v2378_v12  ;;  %686 = vmatpush1.msra.mxu1 %v2395_v18 }
 0x13d   :  { %616 = vmatprep.subr.mxu0 %v2386_v15  ;;  %687 = vmatprep.subr.mxu1 %v2401_v20 }
 0x13e   :  { %617 = vmatpush1.msra.mxu0 %v2392_v17  ;;  %688 = vmatpush1.msra.mxu1 %v2407_v22 }
 0x13f   :  { %618 = vmatprep.subr.mxu0 %v2398_v19  ;;  %689 = vmatprep.subr.mxu1 %v2413_v24 }
 0x140   :  { %619 = vmatpush1.msra.mxu0 %v2404_v21  ;;  %690 = vmatpush1.msra.mxu1 %v2419_v26 }
 0x141   :  { %620 = vmatprep.subr.mxu0 %v2410_v23  ;;  %691 = vmatprep.subr.mxu1 %v2425_v28 }
 0x142   :  { %621 = vmatpush1.msra.mxu0 %v2416_v25  ;;  %692 = vmatpush1.msra.mxu1 %v2431_v30 }
 0x143   :  { %622 = vmatprep.subr.mxu0 %v2422_v27  ;;  %693 = vmatprep.subr.mxu1 %v2437_v32 }
 0x144   :  { %623 = vmatpush1.msra.mxu0 %v2428_v29  ;;  %694 = vmatpush1.msra.mxu1 %v2443_v34 }
 0x145   :  { %624 = vmatprep.subr.mxu0 %v2434_v31  ;;  %695 = vmatprep.subr.mxu1 %v2449_v36 }
 0x146   :  { %625 = vmatpush1.msra.mxu0 %v2440_v33  ;;  %696 = vmatpush1.msra.mxu1 %v2455_v38 }
 0x147   :  { %626 = vmatprep.subr.mxu0 %v2446_v35  ;;  %697 = vmatprep.subr.mxu1 %v2461_v40 }
 0x148   :  { %627 = vmatpush1.msra.mxu0 %v2452_v37  ;;  %698 = vmatpush1.msra.mxu1 %v2467_v42 }
 0x149   :  { %628 = vmatprep.subr.mxu0 %v2458_v39  ;;  %699 = vmatprep.subr.mxu1 %v2473_v44 }
 0x14a   :  { %629 = vmatpush1.msra.mxu0 %v2464_v41  ;;  %700 = vmatpush1.msra.mxu1 %v2479_v46 }
 0x14b   :  { %630 = vmatprep.subr.mxu0 %v2470_v43  ;;  %701 = vmatprep.subr.mxu1 %v3301_v1 }
 0x14c   :  { %631 = vmatpush1.msra.mxu0 %v3302_v6  ;;  %702 = vmatpush1.msra.mxu1 %v3303_v45 }
 0x14d   :  { %632 = vmatprep.subr.mxu0 %v3304_v47  ;;  %703 = vmatprep.subr.mxu1 %v3305_v49 }
 0x14e   :  { %633 = vmatpush1.msra.mxu0 %v3306_v50  ;;  %704 = vmatpush1.msra.mxu1 %v3307_v52 }
 0x14f   :  { %634 = vmatprep.subr.mxu0 %v3308_v54  ;;  %705 = vmatprep.subr.mxu1 %v3309_v55 }
 0x150   :  { %635 = vmatpush1.msra.mxu0 %v3310_v59  ;;  %706 = vmatpush1.msra.mxu1 %v3311_v61  ;;  %v3321_v61 = vld [vmem:[#allocation14_spill] sm:$0xff] }
 0x151   :  { %636 = vmatprep.subr.mxu0 %v3312_v63  ;;  %707 = vmatprep.subr.mxu1 %v3313_v57  ;;  %v3322_v63 = vld [vmem:[#allocation15_spill] sm:$0xff]  ;;  %v302_v57 = vld [vmem:[#allocation4 + $0x20] sm:$0xff]  ;;  %v303_v59 = vld [vmem:[#allocation4 + $0x28] sm:$0xff] }
 0x152   :  { %637 = vmatpush1.msra.mxu0 %v3314_v60  ;;  %708 = vmatpush1.msra.mxu1 %v3315_v62 }
 0x153   :  { %638 = vmatprep.subr.mxu0 %v3316_v53  ;;  %709 = vmatprep.subr.mxu1 %v3317_v51  ;;  %v304_v51 = vld [vmem:[#allocation4 + $0x30] sm:$0xff] }
 0x154   :  { %639 = vmatpush1.msra.mxu0 %v3318_v56  ;;  %672 = vmatprep.mubr.f32.mxu0 %v3319_v58 }
 0x155   :  { %710 = vmatpush1.msra.mxu1 %v3320_v0  ;;  %743 = vmatprep.mubr.f32.mxu1 %v3319_v58  ;;  %v305_v0 = vld [vmem:[#allocation4 + $0x38] sm:$0xff] }
 0x156   :  { %845 = vmatprep.subr.mxu0 %v3321_v61  ;;  %916 = vmatprep.subr.mxu1 %v3322_v63 }
 0x1f5   :  { %v437_v60 = vpop.f32.mrf.mxu0  ;;  %v508_v52 = vpop.f32.mrf.mxu1 }
 0x1f6   :  { %v513_v62 = vadd.f32 %v437_v60, %v302_v57  ;;  %v515_v50 = vadd.f32 %v508_v52, %v304_v51 }
 0x1f7   :  { %v439_v55 = vpop.f32.mrf.mxu0  ;;  %v510_v49 = vpop.f32.mrf.mxu1 }
 0x1f8   :  { %v517_v53 = vmul.f32 0.5, %v513_v62  ;;  %v514_v54 = vadd.f32 %v439_v55, %v303_v59  ;;  %v516_v58 = vadd.f32 %v510_v49, %v305_v0  ;;  %v2756_v0 = vld [vmem:[#allocation7 + $0x1f8] sm:$0xff] }
 0x1f9   :  { %3344 = vst [vmem:[#allocation15_spill] sm:$0xff] %v2756_v0 }
 0x1fa   :  { %2147 = vtanh.f32 %v517_v53  ;;  %v521_v56 = vmul.f32 0.5, %v514_v54  ;;  %v526_v61 = vmul.f32 0.5, %v516_v58  ;;  %v2754_v58 = vld [vmem:[#allocation7 + $0x1e8] sm:$0xff] }
 0x1fb   :  { %3343 = vst [vmem:[#allocation14_spill] sm:$0xff] %v2754_v58 }
 0x1fc   :  { %2149 = vtanh.f32 %v521_v56 }
 0x1fd   :  { %2151 = vtanh.f32 %v515_v50 }
 0x1fe   :  { %2153 = vtanh.f32 %v526_v61  ;;  %v2760_v61 = vld [vmem:[#allocation7 + $0x1e0] sm:$0xff] }
 0x207   :  { %v2148_v47 = vpop.eup %2147 }
 0x208   :  { %v519_v63 = vmul.f32 0.5, %v2148_v47 }
 0x209   :  { %v2150_v45 = vpop.eup %2149 }
 0x20a   :  { %v520_v6 = vadd.f32 0.5, %v519_v63  ;;  %v523_v1 = vmul.f32 0.5, %v2150_v45  ;;  %v2152_v60 = vpop.eup %2151  ;;  %v2762_v63 = vld [vmem:[#allocation7 + $0x1f0] sm:$0xff] }
 0x20b   :  { %v2154_v52 = vpop.eup %2153 }
 0x20c   :  { %v524_v57 = vadd.f32 0.5, %v523_v1  ;;  %v532_v59 = vmul.f32 %v2152_v60, %v520_v6  ;;  %v528_v54 = vmul.f32 0.5, %v2154_v52  ;;  %v2768_v60 = vld [vmem:[#allocation7 + $0x1d8] sm:$0xff] }
 0x20d   :  { %v2780_v52 = vld [vmem:[#allocation7 + $0x1b8] sm:$0xff] }
 0x20e   :  { %v531_v55 = vmul.f32 %v524_v57, %v2611_v48  ;;  %v529_v50 = vadd.f32 0.5, %v528_v54  ;;  %v2766_v57 = vld [vmem:[#allocation7 + $0x1c8] sm:$0xff]  ;;  %v2784_v54 = vld [vmem:[#allocation7 + $0x1a0] sm:$0xff] }
 0x210   :  { %v2681_v62 = vadd.f32 %v532_v59, %v531_v55  ;;  %v2772_v55 = vld [vmem:[#allocation7 + $0x1c0] sm:$0xff]  ;;  %v2774_v59 = vld [vmem:[#allocation7 + $0x1d0] sm:$0xff] }
 0x212   :  { %2155 = vtanh.f32 %v2681_v62 }
 0x21f   :  { %v2156_v49 = vpop.eup %2155 }
 0x220   :  { %v535_v53 = vmul.f32 %v2156_v49, %v529_v50  ;;  %v2786_v50 = vld [vmem:[#allocation7 + $0x1b0] sm:$0xff]  ;;  %v2790_v49 = vld [vmem:[#allocation7 + $0x188] sm:$0xff] }
 0x222   :  { %673 = vmatmul.mubr.f32.vlgmr.msra.gmra.mxu0 %v535_v53  ;;  %744 = vmatmul.mubr.f32.vlgmr.msra.gmra.mxu1 %v535_v53  ;;  %v2792_v53 = vld [vmem:[#allocation7 + $0x198] sm:$0xff] }
 0x223   :  { %846 = vmatpush1.msra.mxu0 %v2351_v2  ;;  %917 = vmatpush1.msra.mxu1 %v2367_v8  ;;  %v3323_v2 = vld [vmem:[#allocation18_spill] sm:$0xff]  ;;  %v3328_v8 = vld [vmem:[#allocation19_spill] sm:$0xff] }
 0x224   :  { %847 = vmatprep.subr.mxu0 %v2353_v3  ;;  %918 = vmatprep.subr.mxu1 %v2369_v9  ;;  %v3324_v3 = vld [vmem:[#allocation16_spill] sm:$0xff] }
 0x225   :  { %848 = vmatpush1.msra.mxu0 %v2356_v4  ;;  %919 = vmatpush1.msra.mxu1 %v2375_v11  ;;  %v3325_v4 = vld [vmem:[#allocation20_spill] sm:$0xff]  ;;  %v3331_v11 = vld [vmem:[#allocation26_spill] sm:$0xff] }
 0x226   :  { %849 = vmatprep.subr.mxu0 %v2359_v5  ;;  %920 = vmatprep.subr.mxu1 %v2381_v13  ;;  %v3326_v5 = vld [vmem:[#allocation17_spill] sm:$0xff]  ;;  %v3329_v9 = vld [vmem:[#allocation24_spill] sm:$0xff] }
 0x227   :  { %850 = vmatpush1.msra.mxu0 %v2364_v7  ;;  %921 = vmatpush1.msra.mxu1 %v2383_v14  ;;  %v3327_v7 = vld [vmem:[#allocation22_spill] sm:$0xff]  ;;  %v3333_v13 = vld [vmem:[#allocation28_spill] sm:$0xff]  ;;  %v3334_v14 = vld [vmem:[#allocation25_spill] sm:$0xff] }
 0x228   :  { %851 = vmatprep.subr.mxu0 %v2372_v10  ;;  %922 = vmatprep.subr.mxu1 %v2389_v16  ;;  %v3330_v10 = vld [vmem:[#allocation21_spill] sm:$0xff]  ;;  %v3336_v16 = vld [vmem:[#allocation27_spill] sm:$0xff] }
 0x229   :  { %852 = vmatpush1.msra.mxu0 %v2378_v12  ;;  %923 = vmatpush1.msra.mxu1 %v2395_v18  ;;  %v3332_v12 = vld [vmem:[#allocation23_spill] sm:$0xff]  ;;  %v3338_v18 = vld [vmem:[#allocation29_spill] sm:$0xff] }
 0x22a   :  { %853 = vmatprep.subr.mxu0 %v2386_v15  ;;  %924 = vmatprep.subr.mxu1 %v2401_v20  ;;  %v3335_v15 = vld [vmem:[#allocation30_spill] sm:$0xff]  ;;  %v3340_v20 = vld [vmem:[#allocation31_spill] sm:$0xff] }
 0x22b   :  { %854 = vmatpush1.msra.mxu0 %v2392_v17  ;;  %925 = vmatpush1.msra.mxu1 %v2407_v22  ;;  %v3337_v17 = vld [vmem:[#allocation32_spill] sm:$0xff]  ;;  %v3342_v22 = vld [vmem:[#allocation34_spill] sm:$0xff] }
 0x22c   :  { %855 = vmatprep.subr.mxu0 %v2398_v19  ;;  %926 = vmatprep.subr.mxu1 %v2413_v24  ;;  %v3339_v19 = vld [vmem:[#allocation33_spill] sm:$0xff] }
 0x22d   :  { %856 = vmatpush1.msra.mxu0 %v2404_v21  ;;  %927 = vmatpush1.msra.mxu1 %v2419_v26  ;;  %v3341_v21 = vmov 0.0  }
 0x22e   :  { %857 = vmatprep.subr.mxu0 %v2410_v23  ;;  %928 = vmatprep.subr.mxu1 %v2425_v28  ;;  %v539_v23 = vld [vmem:[#allocation4 + $0x40] sm:$0xff] }
 0x22f   :  { %858 = vmatpush1.msra.mxu0 %v2416_v25  ;;  %929 = vmatpush1.msra.mxu1 %v2431_v30  ;;  %v540_v25 = vld [vmem:[#allocation4 + $0x48] sm:$0xff]  ;;  %v541_v30 = vld [vmem:[#allocation4 + $0x50] sm:$0xff] }
 0x230   :  { %859 = vmatprep.subr.mxu0 %v2422_v27  ;;  %930 = vmatprep.subr.mxu1 %v2437_v32 }
 0x231   :  { %860 = vmatpush1.msra.mxu0 %v2428_v29  ;;  %931 = vmatpush1.msra.mxu1 %v2443_v34  ;;  %v542_v34 = vld [vmem:[#allocation4 + $0x58] sm:$0xff] }
 0x232   :  { %861 = vmatprep.subr.mxu0 %v2434_v31  ;;  %932 = vmatprep.subr.mxu1 %v2449_v36 }
 0x233   :  { %862 = vmatpush1.msra.mxu0 %v2440_v33  ;;  %933 = vmatpush1.msra.mxu1 %v2455_v38 }
 0x234   :  { %863 = vmatprep.subr.mxu0 %v2446_v35  ;;  %934 = vmatprep.subr.mxu1 %v2461_v40 }
 0x235   :  { %864 = vmatpush1.msra.mxu0 %v2452_v37  ;;  %935 = vmatpush1.msra.mxu1 %v2467_v42 }
 0x236   :  { %865 = vmatprep.subr.mxu0 %v2458_v39  ;;  %936 = vmatprep.subr.mxu1 %v2473_v44 }
 0x237   :  { %866 = vmatpush1.msra.mxu0 %v2464_v41  ;;  %937 = vmatpush1.msra.mxu1 %v2479_v46 }
 0x238   :  { %867 = vmatprep.subr.mxu0 %v2470_v43  ;;  %938 = vmatprep.subr.mxu1 %v3323_v2  ;;  %v2796_v2 = vld [vmem:[#allocation7 + $0x180] sm:$0xff] }
 0x239   :  { %868 = vmatpush1.msra.mxu0 %v3324_v3  ;;  %939 = vmatpush1.msra.mxu1 %v3325_v4  ;;  %v2798_v3 = vld [vmem:[#allocation7 + $0x190] sm:$0xff]  ;;  %v2802_v4 = vld [vmem:[#allocation7 + $0x168] sm:$0xff] }
 0x23a   :  { %869 = vmatprep.subr.mxu0 %v3326_v5  ;;  %940 = vmatprep.subr.mxu1 %v3327_v7  ;;  %v2804_v5 = vld [vmem:[#allocation7 + $0x178] sm:$0xff]  ;;  %v2808_v7 = vld [vmem:[#allocation7 + $0x160] sm:$0xff] }
 0x23b   :  { %870 = vmatpush1.msra.mxu0 %v3328_v8  ;;  %941 = vmatpush1.msra.mxu1 %v3329_v9  ;;  %v2810_v8 = vld [vmem:[#allocation7 + $0x170] sm:$0xff]  ;;  %v2814_v9 = vld [vmem:[#allocation7 + $0x148] sm:$0xff] }
 0x23c   :  { %871 = vmatprep.subr.mxu0 %v3330_v10  ;;  %942 = vmatprep.subr.mxu1 %v3331_v11  ;;  %v2816_v10 = vld [vmem:[#allocation7 + $0x158] sm:$0xff]  ;;  %v2820_v11 = vld [vmem:[#allocation7 + $0x140] sm:$0xff] }
 0x23d   :  { %872 = vmatpush1.msra.mxu0 %v3332_v12  ;;  %943 = vmatpush1.msra.mxu1 %v3333_v13  ;;  %v2822_v12 = vld [vmem:[#allocation7 + $0x150] sm:$0xff]  ;;  %v2826_v13 = vld [vmem:[#allocation7 + $0x128] sm:$0xff] }
 0x23e   :  { %873 = vmatprep.subr.mxu0 %v3334_v14  ;;  %944 = vmatprep.subr.mxu1 %v3335_v15  ;;  %v2828_v14 = vld [vmem:[#allocation7 + $0x138] sm:$0xff]  ;;  %v2832_v15 = vld [vmem:[#allocation7 + $0x120] sm:$0xff] }
 0x23f   :  { %874 = vmatpush1.msra.mxu0 %v3336_v16  ;;  %945 = vmatpush1.msra.mxu1 %v3337_v17  ;;  %v2834_v16 = vld [vmem:[#allocation7 + $0x130] sm:$0xff]  ;;  %v2838_v17 = vld [vmem:[#allocation7 + $0x108] sm:$0xff] }
 0x240   :  { %875 = vmatprep.subr.mxu0 %v3338_v18  ;;  %946 = vmatprep.subr.mxu1 %v3339_v19  ;;  %v2840_v18 = vld [vmem:[#allocation7 + $0x118] sm:$0xff]  ;;  %v2844_v19 = vld [vmem:[#allocation7 + $0x100] sm:$0xff] }
 0x241   :  { %876 = vmatpush1.msra.mxu0 %v3340_v20  ;;  %909 = vmatprep.mubr.f32.mxu0 %v3341_v21  ;;  %v2846_v20 = vld [vmem:[#allocation7 + $0x110] sm:$0xff] }
 0x242   :  { %947 = vmatpush1.msra.mxu1 %v3342_v22  ;;  %980 = vmatprep.mubr.f32.mxu1 %v3341_v21  ;;  %v2850_v22 = vld [vmem:[#allocation7 + $0xe8] sm:$0xff] }
 0x243   :  { %1082 = vmatprep.subr.mxu0 %v2754_v58  ;;  %1153 = vmatprep.subr.mxu1 %v2756_v0 }
 0x2e2   :  { %v674_v24 = vpop.f32.mrf.mxu0  ;;  %v745_v31 = vpop.f32.mrf.mxu1 }
 0x2e3   :  { %v750_v26 = vadd.f32 %v674_v24, %v539_v23  ;;  %v752_v33 = vadd.f32 %v745_v31, %v541_v30  ;;  %v2852_v23 = vld [vmem:[#allocation7 + $0xf8] sm:$0xff]  ;;  %v2854_v24 = vld [vmem:[#allocation7 + $0xe0] sm:$0xff]  ;;  %v2870_v30 = vld [vmem:[#allocation7 + $0xa8] sm:$0xff] }
 0x2e4   :  { %v676_v27 = vpop.f32.mrf.mxu0  ;;  %v747_v35 = vpop.f32.mrf.mxu1  ;;  %v2874_v31 = vld [vmem:[#allocation7 + $0xb8] sm:$0xff] }
 0x2e5   :  { %v754_v28 = vmul.f32 0.5, %v750_v26  ;;  %v751_v29 = vadd.f32 %v676_v27, %v540_v25  ;;  %v753_v36 = vadd.f32 %v747_v35, %v542_v34  ;;  %v2858_v25 = vld [vmem:[#allocation7 + $0xf0] sm:$0xff]  ;;  %v2860_v26 = vld [vmem:[#allocation7 + $0xc8] sm:$0xff]  ;;  %v2862_v27 = vld [vmem:[#allocation7 + $0xd8] sm:$0xff] }
 0x2e6   :  { %v2882_v34 = vld [vmem:[#allocation7 + $0x88] sm:$0xff]  ;;  %v2884_v35 = vld [vmem:[#allocation7 + $0x98] sm:$0xff] }
 0x2e7   :  { %2157 = vtanh.f32 %v754_v28  ;;  %v758_v32 = vmul.f32 0.5, %v751_v29  ;;  %v763_v37 = vmul.f32 0.5, %v753_v36  ;;  %v2866_v28 = vld [vmem:[#allocation7 + $0xc0] sm:$0xff]  ;;  %v2868_v29 = vld [vmem:[#allocation7 + $0xd0] sm:$0xff]  ;;  %3345 = vst [vmem:[#allocation18_spill] sm:$0xff] %v2884_v35 }
 0x2e8   :  { %v2888_v36 = vld [vmem:[#allocation7 + $0x80] sm:$0xff] }
 0x2e9   :  { %2159 = vtanh.f32 %v758_v32  ;;  %v2876_v32 = vld [vmem:[#allocation7 + $0xa0] sm:$0xff]  ;;  %3346 = vst [vmem:[#allocation16_spill] sm:$0xff] %v2888_v36 }
 0x2ea   :  { %2161 = vtanh.f32 %v752_v33  ;;  %v2878_v33 = vld [vmem:[#allocation7 + $0xb0] sm:$0xff] }
 0x2eb   :  { %2163 = vtanh.f32 %v763_v37  ;;  %v2890_v37 = vld [vmem:[#allocation7 + $0x90] sm:$0xff] }
 0x2ec   :  { %3347 = vst [vmem:[#allocation20_spill] sm:$0xff] %v2890_v37 }
 0x2f4   :  { %v2158_v38 = vpop.eup %2157 }
 0x2f5   :  { %v756_v39 = vmul.f32 0.5, %v2158_v38  ;;  %v2894_v38 = vld [vmem:[#allocation7 + $0x68] sm:$0xff] }
 0x2f6   :  { %v2160_v40 = vpop.eup %2159  ;;  %3348 = vst [vmem:[#allocation17_spill] sm:$0xff] %v2894_v38 }
 0x2f7   :  { %v757_v41 = vadd.f32 0.5, %v756_v39  ;;  %v760_v42 = vmul.f32 0.5, %v2160_v40  ;;  %v2162_v44 = vpop.eup %2161  ;;  %v2896_v39 = vld [vmem:[#allocation7 + $0x78] sm:$0xff]  ;;  %v2900_v40 = vld [vmem:[#allocation7 + $0x60] sm:$0xff] }
 0x2f8   :  { %v2164_v6 = vpop.eup %2163  ;;  %3349 = vst [vmem:[#allocation22_spill] sm:$0xff] %v2896_v39  ;;  %3350 = vst [vmem:[#allocation19_spill] sm:$0xff] %v2900_v40 }
 0x2f9   :  { %v761_v43 = vadd.f32 0.5, %v760_v42  ;;  %v769_v48 = vmul.f32 %v2162_v44, %v757_v41  ;;  %v765_v45 = vmul.f32 0.5, %v2164_v6  ;;  %v2902_v41 = vld [vmem:[#allocation7 + $0x70] sm:$0xff]  ;;  %v2906_v42 = vld [vmem:[#allocation7 + $0x48] sm:$0xff]  ;;  %v2912_v44 = vld [vmem:[#allocation7 + $0x40] sm:$0xff] }
 0x2fa   :  { %3351 = vst [vmem:[#allocation24_spill] sm:$0xff] %v2902_v41  ;;  %3352 = vst [vmem:[#allocation21_spill] sm:$0xff] %v2906_v42  ;;  %v2920_v6 = vld [vmem:[#allocation7 + $0x38] sm:$0xff] }
 0x2fb   :  { %v768_v46 = vmul.f32 %v761_v43, %v2681_v62  ;;  %v766_v47 = vadd.f32 0.5, %v765_v45  ;;  %v2778_v62 = vld [vmem:[#allocation7 + $0x1a8] sm:$0xff]  ;;  %v2908_v43 = vld [vmem:[#allocation7 + $0x58] sm:$0xff]  ;;  %3354 = vst [vmem:[#allocation23_spill] sm:$0xff] %v2912_v44  ;;  %3357 = vst [vmem:[#allocation30_spill] sm:$0xff] %v2920_v6 }
 0x2fc   :  { %3353 = vst [vmem:[#allocation26_spill] sm:$0xff] %v2908_v43  ;;  %v2924_v45 = vld [vmem:[#allocation7 + $0x20] sm:$0xff] }
 0x2fd   :  { %v2749_v1 = vadd.f32 %v769_v48, %v768_v46  ;;  %v2914_v46 = vld [vmem:[#allocation7 + $0x50] sm:$0xff]  ;;  %v2918_v48 = vld [vmem:[#allocation7 + $0x28] sm:$0xff]  ;;  %3358 = vst [vmem:[#allocation27_spill] sm:$0xff] %v2924_v45 }
 0x2fe   :  { %3355 = vst [vmem:[#allocation28_spill] sm:$0xff] %v2914_v46  ;;  %3356 = vst [vmem:[#allocation25_spill] sm:$0xff] %v2918_v48 }
 0x2ff   :  { %2165 = vtanh.f32 %v2749_v1 }
 0x30c   :  { %v2166_v51 = vpop.eup %2165 }
 0x30d   :  { %v772_v56 = vmul.f32 %v2166_v51, %v766_v47  ;;  %v2926_v47 = vld [vmem:[#allocation7 + $0x30] sm:$0xff]  ;;  %v2930_v51 = vld [vmem:[#allocation7 + $0x8] sm:$0xff] }
 0x30e   :  { %3359 = vst [vmem:[#allocation32_spill] sm:$0xff] %v2926_v47  ;;  %3360 = vst [vmem:[#allocation29_spill] sm:$0xff] %v2930_v51 }
 0x30f   :  { %910 = vmatmul.mubr.f32.vlgmr.msra.gmra.mxu0 %v772_v56  ;;  %981 = vmatmul.mubr.f32.vlgmr.msra.gmra.mxu1 %v772_v56  ;;  %v2932_v56 = vld [vmem:[#allocation7 + $0x18] sm:$0xff] }
 0x310   :  { %1146 = vmatprep.mubr.f32.mxu0 %v3341_v21  ;;  %1217 = vmatprep.mubr.f32.mxu1 %v3341_v21  ;;  %3361 = vst [vmem:[#allocation33_spill] sm:$0xff] %v2932_v56  ;;  %v2936_v21 = vld [vmem:[#allocation7] sm:$0xff] }
 0x311   :  { %1083 = vmatpush1.msra.mxu0 %v2760_v61  ;;  %1154 = vmatpush1.msra.mxu1 %v2762_v63  ;;  %3362 = vst [vmem:[#allocation31_spill] sm:$0xff] %v2936_v21 }
 0x312   :  { %1084 = vmatprep.subr.mxu0 %v2766_v57  ;;  %1155 = vmatprep.subr.mxu1 %v2768_v60 }
 0x313   :  { %1085 = vmatpush1.msra.mxu0 %v2772_v55  ;;  %1156 = vmatpush1.msra.mxu1 %v2774_v59 }
 0x314   :  { %1086 = vmatprep.subr.mxu0 %v2778_v62  ;;  %1157 = vmatprep.subr.mxu1 %v2780_v52 }
 0x315   :  { %1087 = vmatpush1.msra.mxu0 %v2784_v54  ;;  %1158 = vmatpush1.msra.mxu1 %v2786_v50 }
 0x316   :  { %1088 = vmatprep.subr.mxu0 %v2790_v49  ;;  %1159 = vmatprep.subr.mxu1 %v2792_v53 }
 0x317   :  { %1089 = vmatpush1.msra.mxu0 %v2796_v2  ;;  %1160 = vmatpush1.msra.mxu1 %v2798_v3 }
 0x318   :  { %1090 = vmatprep.subr.mxu0 %v2802_v4  ;;  %1161 = vmatprep.subr.mxu1 %v2804_v5 }
 0x319   :  { %1091 = vmatpush1.msra.mxu0 %v2808_v7  ;;  %1162 = vmatpush1.msra.mxu1 %v2810_v8 }
 0x31a   :  { %1092 = vmatprep.subr.mxu0 %v2814_v9  ;;  %1163 = vmatprep.subr.mxu1 %v2816_v10 }
 0x31b   :  { %1093 = vmatpush1.msra.mxu0 %v2820_v11  ;;  %1164 = vmatpush1.msra.mxu1 %v2822_v12 }
 0x31c   :  { %1094 = vmatprep.subr.mxu0 %v2826_v13  ;;  %1165 = vmatprep.subr.mxu1 %v2828_v14 }
 0x31d   :  { %1095 = vmatpush1.msra.mxu0 %v2832_v15  ;;  %1166 = vmatpush1.msra.mxu1 %v2834_v16 }
 0x31e   :  { %1096 = vmatprep.subr.mxu0 %v2838_v17  ;;  %1167 = vmatprep.subr.mxu1 %v2840_v18 }
 0x31f   :  { %1097 = vmatpush1.msra.mxu0 %v2844_v19  ;;  %1168 = vmatpush1.msra.mxu1 %v2846_v20 }
 0x320   :  { %1098 = vmatprep.subr.mxu0 %v2850_v22  ;;  %1169 = vmatprep.subr.mxu1 %v2852_v23 }
 0x321   :  { %1099 = vmatpush1.msra.mxu0 %v2854_v24  ;;  %1170 = vmatpush1.msra.mxu1 %v2858_v25 }
 0x322   :  { %1100 = vmatprep.subr.mxu0 %v2860_v26  ;;  %1171 = vmatprep.subr.mxu1 %v2862_v27 }
 0x323   :  { %1101 = vmatpush1.msra.mxu0 %v2866_v28  ;;  %1172 = vmatpush1.msra.mxu1 %v2868_v29 }
 0x324   :  { %1102 = vmatprep.subr.mxu0 %v2870_v30  ;;  %1173 = vmatprep.subr.mxu1 %v2874_v31 }
 0x325   :  { %1103 = vmatpush1.msra.mxu0 %v2876_v32  ;;  %1174 = vmatpush1.msra.mxu1 %v2878_v33 }
 0x326   :  { %1104 = vmatprep.subr.mxu0 %v2882_v34  ;;  %1175 = vmatprep.subr.mxu1 %v2884_v35 }
 0x327   :  { %1105 = vmatpush1.msra.mxu0 %v2888_v36  ;;  %1176 = vmatpush1.msra.mxu1 %v2890_v37 }
 0x328   :  { %1106 = vmatprep.subr.mxu0 %v2894_v38  ;;  %1177 = vmatprep.subr.mxu1 %v2896_v39 }
 0x329   :  { %1107 = vmatpush1.msra.mxu0 %v2900_v40  ;;  %1178 = vmatpush1.msra.mxu1 %v2902_v41 }
 0x32a   :  { %1108 = vmatprep.subr.mxu0 %v2906_v42  ;;  %1179 = vmatprep.subr.mxu1 %v2908_v43  ;;  %v2938_v42 = vld [vmem:[#allocation7 + $0x10] sm:$0xff] }
 0x32b   :  { %1109 = vmatpush1.msra.mxu0 %v2912_v44  ;;  %1180 = vmatpush1.msra.mxu1 %v2914_v46  ;;  %3363 = vst [vmem:[#allocation34_spill] sm:$0xff] %v2938_v42  ;;  %v777_v46 = vld [vmem:[#allocation4 + $0x68] sm:$0xff] }
 0x32c   :  { %1110 = vmatprep.subr.mxu0 %v2918_v48  ;;  %1181 = vmatprep.subr.mxu1 %v2920_v6  ;;  %v776_v6 = vld [vmem:[#allocation4 + $0x60] sm:$0xff] }
 0x32d   :  { %1111 = vmatpush1.msra.mxu0 %v2924_v45  ;;  %1182 = vmatpush1.msra.mxu1 %v2926_v47  ;;  %v778_v47 = vld [vmem:[#allocation4 + $0x70] sm:$0xff] }
 0x32e   :  { %1112 = vmatprep.subr.mxu0 %v2930_v51  ;;  %1183 = vmatprep.subr.mxu1 %v2932_v56 }
 0x32f   :  { %1113 = vmatpush1.msra.mxu0 %v2936_v21  ;;  %1184 = vmatpush1.msra.mxu1 %v2938_v42  ;;  %v779_v21 = vld [vmem:[#allocation4 + $0x78] sm:$0xff] }
 0x330   :  { %1319 = vmatprep.subr.mxu0 %v2754_v58  ;;  %1390 = vmatprep.subr.mxu1 %v2756_v0 }
 0x3cf   :  { %v911_v48 = vpop.f32.mrf.mxu0  ;;  %v982_v40 = vpop.f32.mrf.mxu1 }
 0x3d0   :  { %v987_v44 = vadd.f32 %v911_v48, %v776_v6  ;;  %v989_v56 = vadd.f32 %v982_v40, %v778_v47  ;;  %v3372_v47 = vld [vmem:[#allocation26_spill] sm:$0xff] }
 0x3d1   :  { %v913_v43 = vpop.f32.mrf.mxu0  ;;  %v984_v39 = vpop.f32.mrf.mxu1 }
 0x3d2   :  { %v991_v45 = vmul.f32 0.5, %v987_v44  ;;  %v988_v41 = vadd.f32 %v913_v43, %v777_v46  ;;  %v990_v42 = vadd.f32 %v984_v39, %v779_v21 }
 0x3d4   :  { %2167 = vtanh.f32 %v991_v45  ;;  %v995_v51 = vmul.f32 0.5, %v988_v41  ;;  %v1000_v58 = vmul.f32 0.5, %v990_v42  ;;  %v3371_v42 = vld [vmem:[#allocation21_spill] sm:$0xff] }
 0x3d6   :  { %2169 = vtanh.f32 %v995_v51  ;;  %v3373_v51 = vld [vmem:[#allocation23_spill] sm:$0xff] }
 0x3d7   :  { %2171 = vtanh.f32 %v989_v56  ;;  %v3374_v56 = vld [vmem:[#allocation28_spill] sm:$0xff] }
 0x3d8   :  { %2173 = vtanh.f32 %v1000_v58  ;;  %v3365_v58 = vld [vmem:[#allocation16_spill] sm:$0xff] }
 0x3e1   :  { %v2168_v38 = vpop.eup %2167 }
 0x3e2   :  { %v993_v0 = vmul.f32 0.5, %v2168_v38  ;;  %v3370_v38 = vld [vmem:[#allocation24_spill] sm:$0xff] }
 0x3e3   :  { %v2170_v37 = vpop.eup %2169 }
 0x3e4   :  { %v994_v36 = vadd.f32 0.5, %v993_v0  ;;  %v997_v35 = vmul.f32 0.5, %v2170_v37  ;;  %v2172_v44 = vpop.eup %2171  ;;  %v3366_v0 = vld [vmem:[#allocation20_spill] sm:$0xff]  ;;  %v3369_v37 = vld [vmem:[#allocation19_spill] sm:$0xff] }
 0x3e5   :  { %v2174_v40 = vpop.eup %2173 }
 0x3e6   :  { %v998_v48 = vadd.f32 0.5, %v997_v35  ;;  %v1006_v46 = vmul.f32 %v2172_v44, %v994_v36  ;;  %v1002_v41 = vmul.f32 0.5, %v2174_v40  ;;  %v3367_v35 = vld [vmem:[#allocation17_spill] sm:$0xff]  ;;  %v3368_v36 = vld [vmem:[#allocation22_spill] sm:$0xff] }
 0x3e7   :  { %v3376_v44 = vld [vmem:[#allocation30_spill] sm:$0xff]  ;;  %v3379_v40 = vld [vmem:[#allocation29_spill] sm:$0xff] }
 0x3e8   :  { %v1005_v43 = vmul.f32 %v998_v48, %v2749_v1  ;;  %v1003_v45 = vadd.f32 0.5, %v1002_v41  ;;  %v3364_v1 = vld [vmem:[#allocation18_spill] sm:$0xff]  ;;  %v3375_v48 = vld [vmem:[#allocation25_spill] sm:$0xff] }
 0x3e9   :  { %v3380_v41 = vld [vmem:[#allocation33_spill] sm:$0xff] }
 0x3ea   :  { %v2949_v6 = vadd.f32 %v1006_v46, %v1005_v43  ;;  %v3377_v43 = vld [vmem:[#allocation27_spill] sm:$0xff]  ;;  %v3378_v46 = vld [vmem:[#allocation32_spill] sm:$0xff] }
 0x3ec   :  { %2175 = vtanh.f32 %v2949_v6 }
 0x3f9   :  { %v2176_v21 = vpop.eup %2175 }
 0x3fa   :  { %v1009_v39 = vmul.f32 %v2176_v21, %v1003_v45  ;;  %v3381_v45 = vld [vmem:[#allocation31_spill] sm:$0xff]  ;;  %v3382_v21 = vmov 0.0  }
 0x3fc   :  { %1147 = vmatmul.mubr.f32.vlgmr.msra.gmra.mxu0 %v1009_v39  ;;  %1218 = vmatmul.mubr.f32.vlgmr.msra.gmra.mxu1 %v1009_v39  ;;  %v3383_v39 = vld [vmem:[#allocation34_spill] sm:$0xff] }
 0x3fd   :  { %1320 = vmatpush1.msra.mxu0 %v2760_v61  ;;  %1391 = vmatpush1.msra.mxu1 %v2762_v63 }
 0x3fe   :  { %1321 = vmatprep.subr.mxu0 %v2766_v57  ;;  %1392 = vmatprep.subr.mxu1 %v2768_v60 }
 0x3ff   :  { %1322 = vmatpush1.msra.mxu0 %v2772_v55  ;;  %1393 = vmatpush1.msra.mxu1 %v2774_v59 }
 0x400   :  { %1323 = vmatprep.subr.mxu0 %v2778_v62  ;;  %1394 = vmatprep.subr.mxu1 %v2780_v52 }
 0x401   :  { %1324 = vmatpush1.msra.mxu0 %v2784_v54  ;;  %1395 = vmatpush1.msra.mxu1 %v2786_v50 }
 0x402   :  { %1325 = vmatprep.subr.mxu0 %v2790_v49  ;;  %1396 = vmatprep.subr.mxu1 %v2792_v53 }
 0x403   :  { %1326 = vmatpush1.msra.mxu0 %v2796_v2  ;;  %1397 = vmatpush1.msra.mxu1 %v2798_v3 }
 0x404   :  { %1327 = vmatprep.subr.mxu0 %v2802_v4  ;;  %1398 = vmatprep.subr.mxu1 %v2804_v5 }
 0x405   :  { %1328 = vmatpush1.msra.mxu0 %v2808_v7  ;;  %1399 = vmatpush1.msra.mxu1 %v2810_v8 }
 0x406   :  { %1329 = vmatprep.subr.mxu0 %v2814_v9  ;;  %1400 = vmatprep.subr.mxu1 %v2816_v10 }
 0x407   :  { %1330 = vmatpush1.msra.mxu0 %v2820_v11  ;;  %1401 = vmatpush1.msra.mxu1 %v2822_v12 }
 0x408   :  { %1331 = vmatprep.subr.mxu0 %v2826_v13  ;;  %1402 = vmatprep.subr.mxu1 %v2828_v14 }
 0x409   :  { %1332 = vmatpush1.msra.mxu0 %v2832_v15  ;;  %1403 = vmatpush1.msra.mxu1 %v2834_v16 }
 0x40a   :  { %1333 = vmatprep.subr.mxu0 %v2838_v17  ;;  %1404 = vmatprep.subr.mxu1 %v2840_v18 }
 0x40b   :  { %1334 = vmatpush1.msra.mxu0 %v2844_v19  ;;  %1405 = vmatpush1.msra.mxu1 %v2846_v20 }
 0x40c   :  { %1335 = vmatprep.subr.mxu0 %v2850_v22  ;;  %1406 = vmatprep.subr.mxu1 %v2852_v23 }
 0x40d   :  { %1336 = vmatpush1.msra.mxu0 %v2854_v24  ;;  %1407 = vmatpush1.msra.mxu1 %v2858_v25 }
 0x40e   :  { %1337 = vmatprep.subr.mxu0 %v2860_v26  ;;  %1408 = vmatprep.subr.mxu1 %v2862_v27 }
 0x40f   :  { %1338 = vmatpush1.msra.mxu0 %v2866_v28  ;;  %1409 = vmatpush1.msra.mxu1 %v2868_v29 }
 0x410   :  { %1339 = vmatprep.subr.mxu0 %v2870_v30  ;;  %1410 = vmatprep.subr.mxu1 %v2874_v31 }
 0x411   :  { %1340 = vmatpush1.msra.mxu0 %v2876_v32  ;;  %1411 = vmatpush1.msra.mxu1 %v2878_v33 }
 0x412   :  { %1341 = vmatprep.subr.mxu0 %v2882_v34  ;;  %1412 = vmatprep.subr.mxu1 %v3364_v1 }
 0x413   :  { %1342 = vmatpush1.msra.mxu0 %v3365_v58  ;;  %1413 = vmatpush1.msra.mxu1 %v3366_v0 }
 0x414   :  { %1343 = vmatprep.subr.mxu0 %v3367_v35  ;;  %1414 = vmatprep.subr.mxu1 %v3368_v36 }
 0x415   :  { %1344 = vmatpush1.msra.mxu0 %v3369_v37  ;;  %1415 = vmatpush1.msra.mxu1 %v3370_v38 }
 0x416   :  { %1345 = vmatprep.subr.mxu0 %v3371_v42  ;;  %1416 = vmatprep.subr.mxu1 %v3372_v47 }
 0x417   :  { %1346 = vmatpush1.msra.mxu0 %v3373_v51  ;;  %1417 = vmatpush1.msra.mxu1 %v3374_v56  ;;  %v3384_v56 = vld [vmem:[#allocation14_spill] sm:$0xff] }
 0x418   :  { %1347 = vmatprep.subr.mxu0 %v3375_v48  ;;  %1418 = vmatprep.subr.mxu1 %v3376_v44  ;;  %v3385_v48 = vld [vmem:[#allocation15_spill] sm:$0xff]  ;;  %v1013_v44 = vld [vmem:[#allocation4 + $0x80] sm:$0xff]  ;;  %v1014_v51 = vld [vmem:[#allocation4 + $0x88] sm:$0xff] }
 0x419   :  { %1348 = vmatpush1.msra.mxu0 %v3377_v43  ;;  %1419 = vmatpush1.msra.mxu1 %v3378_v46 }
 0x41a   :  { %1349 = vmatprep.subr.mxu0 %v3379_v40  ;;  %1420 = vmatprep.subr.mxu1 %v3380_v41  ;;  %v1015_v41 = vld [vmem:[#allocation4 + $0x90] sm:$0xff] }
 0x41b   :  { %1350 = vmatpush1.msra.mxu0 %v3381_v45  ;;  %1383 = vmatprep.mubr.f32.mxu0 %v3382_v21 }
 0x41c   :  { %1421 = vmatpush1.msra.mxu1 %v3383_v39  ;;  %1454 = vmatprep.mubr.f32.mxu1 %v3382_v21  ;;  %v1016_v39 = vld [vmem:[#allocation4 + $0x98] sm:$0xff] }
 0x41d   :  { %1556 = vmatprep.subr.mxu0 %v3384_v56  ;;  %1627 = vmatprep.subr.mxu1 %v3385_v48 }
 0x4bc   :  { %v1148_v43 = vpop.f32.mrf.mxu0  ;;  %v1219_v38 = vpop.f32.mrf.mxu1 }
 0x4bd   :  { %v1224_v46 = vadd.f32 %v1148_v43, %v1013_v44  ;;  %v1226_v37 = vadd.f32 %v1219_v38, %v1015_v41  ;;  %v3393_v41 = vld [vmem:[#allocation21_spill] sm:$0xff] }
 0x4be   :  { %v1150_v47 = vpop.f32.mrf.mxu0  ;;  %v1221_v36 = vpop.f32.mrf.mxu1 }
 0x4bf   :  { %v1228_v40 = vmul.f32 0.5, %v1224_v46  ;;  %v1225_v42 = vadd.f32 %v1150_v47, %v1014_v51  ;;  %v1227_v21 = vadd.f32 %v1221_v36, %v1016_v39  ;;  %v3396_v39 = vld [vmem:[#allocation28_spill] sm:$0xff] }
 0x4c1   :  { %2177 = vtanh.f32 %v1228_v40  ;;  %v1232_v45 = vmul.f32 0.5, %v1225_v42  ;;  %v1237_v56 = vmul.f32 0.5, %v1227_v21  ;;  %v3395_v21 = vld [vmem:[#allocation23_spill] sm:$0xff] }
 0x4c3   :  { %2179 = vtanh.f32 %v1232_v45  ;;  %v3394_v45 = vld [vmem:[#allocation26_spill] sm:$0xff] }
 0x4c4   :  { %2181 = vtanh.f32 %v1226_v37 }
 0x4c5   :  { %2183 = vtanh.f32 %v1237_v56  ;;  %v3391_v56 = vld [vmem:[#allocation19_spill] sm:$0xff] }
 0x4ce   :  { %v2178_v35 = vpop.eup %2177 }
 0x4cf   :  { %v1230_v48 = vmul.f32 0.5, %v2178_v35  ;;  %v3390_v35 = vld [vmem:[#allocation22_spill] sm:$0xff] }
 0x4d0   :  { %v2180_v0 = vpop.eup %2179 }
 0x4d1   :  { %v1231_v58 = vadd.f32 0.5, %v1230_v48  ;;  %v1234_v1 = vmul.f32 0.5, %v2180_v0  ;;  %v2182_v43 = vpop.eup %2181  ;;  %v3389_v0 = vld [vmem:[#allocation17_spill] sm:$0xff]  ;;  %v3392_v48 = vld [vmem:[#allocation24_spill] sm:$0xff] }
 0x4d2   :  { %v2184_v38 = vpop.eup %2183 }
 0x4d3   :  { %v1235_v44 = vadd.f32 0.5, %v1234_v1  ;;  %v1243_v51 = vmul.f32 %v2182_v43, %v1231_v58  ;;  %v1239_v42 = vmul.f32 0.5, %v2184_v38  ;;  %v3387_v1 = vld [vmem:[#allocation16_spill] sm:$0xff]  ;;  %v3398_v43 = vld [vmem:[#allocation30_spill] sm:$0xff]  ;;  %v3401_v38 = vld [vmem:[#allocation29_spill] sm:$0xff] }
 0x4d4   :  { %v3388_v58 = vld [vmem:[#allocation20_spill] sm:$0xff] }
 0x4d5   :  { %v1242_v47 = vmul.f32 %v1235_v44, %v2949_v6  ;;  %v1240_v37 = vadd.f32 0.5, %v1239_v42  ;;  %v3386_v6 = vld [vmem:[#allocation18_spill] sm:$0xff]  ;;  %v3397_v44 = vld [vmem:[#allocation25_spill] sm:$0xff] }
 0x4d6   :  { %v3402_v42 = vld [vmem:[#allocation33_spill] sm:$0xff] }
 0x4d7   :  { %v3019_v46 = vadd.f32 %v1243_v51, %v1242_v47  ;;  %v3399_v47 = vld [vmem:[#allocation27_spill] sm:$0xff]  ;;  %v3400_v51 = vld [vmem:[#allocation32_spill] sm:$0xff] }
 0x4d9   :  { %2185 = vtanh.f32 %v3019_v46 }
 0x4e6   :  { %v2186_v36 = vpop.eup %2185 }
 0x4e7   :  { %v1246_v40 = vmul.f32 %v2186_v36, %v1240_v37  ;;  %v3403_v37 = vld [vmem:[#allocation31_spill] sm:$0xff]  ;;  %v3404_v36 = vmov 0.0  }
 0x4e9   :  { %1384 = vmatmul.mubr.f32.vlgmr.msra.gmra.mxu0 %v1246_v40  ;;  %1455 = vmatmul.mubr.f32.vlgmr.msra.gmra.mxu1 %v1246_v40  ;;  %v3405_v40 = vld [vmem:[#allocation34_spill] sm:$0xff] }
 0x4ea   :  { %1557 = vmatpush1.msra.mxu0 %v2760_v61  ;;  %1628 = vmatpush1.msra.mxu1 %v2762_v63 }
 0x4eb   :  { %1558 = vmatprep.subr.mxu0 %v2766_v57  ;;  %1629 = vmatprep.subr.mxu1 %v2768_v60 }
 0x4ec   :  { %1559 = vmatpush1.msra.mxu0 %v2772_v55  ;;  %1630 = vmatpush1.msra.mxu1 %v2774_v59 }
 0x4ed   :  { %1560 = vmatprep.subr.mxu0 %v2778_v62  ;;  %1631 = vmatprep.subr.mxu1 %v2780_v52 }
 0x4ee   :  { %1561 = vmatpush1.msra.mxu0 %v2784_v54  ;;  %1632 = vmatpush1.msra.mxu1 %v2786_v50 }
 0x4ef   :  { %1562 = vmatprep.subr.mxu0 %v2790_v49  ;;  %1633 = vmatprep.subr.mxu1 %v2792_v53 }
 0x4f0   :  { %1563 = vmatpush1.msra.mxu0 %v2796_v2  ;;  %1634 = vmatpush1.msra.mxu1 %v2798_v3 }
 0x4f1   :  { %1564 = vmatprep.subr.mxu0 %v2802_v4  ;;  %1635 = vmatprep.subr.mxu1 %v2804_v5 }
 0x4f2   :  { %1565 = vmatpush1.msra.mxu0 %v2808_v7  ;;  %1636 = vmatpush1.msra.mxu1 %v2810_v8 }
 0x4f3   :  { %1566 = vmatprep.subr.mxu0 %v2814_v9  ;;  %1637 = vmatprep.subr.mxu1 %v2816_v10 }
 0x4f4   :  { %1567 = vmatpush1.msra.mxu0 %v2820_v11  ;;  %1638 = vmatpush1.msra.mxu1 %v2822_v12 }
 0x4f5   :  { %1568 = vmatprep.subr.mxu0 %v2826_v13  ;;  %1639 = vmatprep.subr.mxu1 %v2828_v14 }
 0x4f6   :  { %1569 = vmatpush1.msra.mxu0 %v2832_v15  ;;  %1640 = vmatpush1.msra.mxu1 %v2834_v16 }
 0x4f7   :  { %1570 = vmatprep.subr.mxu0 %v2838_v17  ;;  %1641 = vmatprep.subr.mxu1 %v2840_v18 }
 0x4f8   :  { %1571 = vmatpush1.msra.mxu0 %v2844_v19  ;;  %1642 = vmatpush1.msra.mxu1 %v2846_v20 }
 0x4f9   :  { %1572 = vmatprep.subr.mxu0 %v2850_v22  ;;  %1643 = vmatprep.subr.mxu1 %v2852_v23 }
 0x4fa   :  { %1573 = vmatpush1.msra.mxu0 %v2854_v24  ;;  %1644 = vmatpush1.msra.mxu1 %v2858_v25 }
 0x4fb   :  { %1574 = vmatprep.subr.mxu0 %v2860_v26  ;;  %1645 = vmatprep.subr.mxu1 %v2862_v27 }
 0x4fc   :  { %1575 = vmatpush1.msra.mxu0 %v2866_v28  ;;  %1646 = vmatpush1.msra.mxu1 %v2868_v29 }
 0x4fd   :  { %1576 = vmatprep.subr.mxu0 %v2870_v30  ;;  %1647 = vmatprep.subr.mxu1 %v2874_v31 }
 0x4fe   :  { %1577 = vmatpush1.msra.mxu0 %v2876_v32  ;;  %1648 = vmatpush1.msra.mxu1 %v2878_v33 }
 0x4ff   :  { %1578 = vmatprep.subr.mxu0 %v2882_v34  ;;  %1649 = vmatprep.subr.mxu1 %v3386_v6 }
 0x500   :  { %1579 = vmatpush1.msra.mxu0 %v3387_v1  ;;  %1650 = vmatpush1.msra.mxu1 %v3388_v58 }
 0x501   :  { %1580 = vmatprep.subr.mxu0 %v3389_v0  ;;  %1651 = vmatprep.subr.mxu1 %v3390_v35 }
 0x502   :  { %1581 = vmatpush1.msra.mxu0 %v3391_v56  ;;  %1652 = vmatpush1.msra.mxu1 %v3392_v48 }
 0x503   :  { %1582 = vmatprep.subr.mxu0 %v3393_v41  ;;  %1653 = vmatprep.subr.mxu1 %v3394_v45 }
 0x504   :  { %1583 = vmatpush1.msra.mxu0 %v3395_v21  ;;  %1654 = vmatpush1.msra.mxu1 %v3396_v39  ;;  %v3406_v39 = vld [vmem:[#allocation14_spill] sm:$0xff] }
 0x505   :  { %1584 = vmatprep.subr.mxu0 %v3397_v44  ;;  %1655 = vmatprep.subr.mxu1 %v3398_v43  ;;  %v3407_v44 = vld [vmem:[#allocation15_spill] sm:$0xff]  ;;  %v1250_v43 = vld [vmem:[#allocation4 + $0xa0] sm:$0xff]  ;;  %v1251_v21 = vld [vmem:[#allocation4 + $0xa8] sm:$0xff] }
 0x506   :  { %1585 = vmatpush1.msra.mxu0 %v3399_v47  ;;  %1656 = vmatpush1.msra.mxu1 %v3400_v51 }
 0x507   :  { %1586 = vmatprep.subr.mxu0 %v3401_v38  ;;  %1657 = vmatprep.subr.mxu1 %v3402_v42  ;;  %v1252_v42 = vld [vmem:[#allocation4 + $0xb0] sm:$0xff] }
 0x508   :  { %1587 = vmatpush1.msra.mxu0 %v3403_v37  ;;  %1620 = vmatprep.mubr.f32.mxu0 %v3404_v36 }
 0x509   :  { %1658 = vmatpush1.msra.mxu1 %v3405_v40  ;;  %1691 = vmatprep.mubr.f32.mxu1 %v3404_v36  ;;  %v1253_v40 = vld [vmem:[#allocation4 + $0xb8] sm:$0xff] }
 0x50a   :  { %1793 = vmatprep.subr.mxu0 %v3406_v39  ;;  %1864 = vmatprep.subr.mxu1 %v3407_v44 }
 0x5a9   :  { %v1385_v47 = vpop.f32.mrf.mxu0  ;;  %v1456_v48 = vpop.f32.mrf.mxu1 }
 0x5aa   :  { %v1461_v51 = vadd.f32 %v1385_v47, %v1250_v43  ;;  %v1463_v56 = vadd.f32 %v1456_v48, %v1252_v42 }
 0x5ab   :  { %v1387_v45 = vpop.f32.mrf.mxu0  ;;  %v1458_v35 = vpop.f32.mrf.mxu1 }
 0x5ac   :  { %v1465_v38 = vmul.f32 0.5, %v1461_v51  ;;  %v1462_v41 = vadd.f32 %v1387_v45, %v1251_v21  ;;  %v1464_v36 = vadd.f32 %v1458_v35, %v1253_v40  ;;  %v1978_v40 = vld [vmem:[#allocation9 + $0x70] sm:$0xff] }
 0x5ae   :  { %2187 = vtanh.f32 %v1465_v38  ;;  %v1469_v37 = vmul.f32 0.5, %v1462_v41  ;;  %v1474_v39 = vmul.f32 0.5, %v1464_v36  ;;  %v1979_v36 = vld [vmem:[#allocation9 + $0x78] sm:$0xff] }
 0x5b0   :  { %2189 = vtanh.f32 %v1469_v37 }
 0x5b1   :  { %2191 = vtanh.f32 %v1463_v56 }
 0x5b2   :  { %2193 = vtanh.f32 %v1474_v39  ;;  %v1977_v39 = vld [vmem:[#allocation9 + $0x68] sm:$0xff] }
 0x5bb   :  { %v2188_v0 = vpop.eup %2187 }
 0x5bc   :  { %v1467_v44 = vmul.f32 0.5, %v2188_v0 }
 0x5bd   :  { %v2190_v58 = vpop.eup %2189 }
 0x5be   :  { %v1468_v1 = vadd.f32 0.5, %v1467_v44  ;;  %v1471_v6 = vmul.f32 0.5, %v2190_v58  ;;  %v2192_v47 = vpop.eup %2191  ;;  %v1976_v44 = vld [vmem:[#allocation9 + $0x60] sm:$0xff] }
 0x5bf   :  { %v2194_v48 = vpop.eup %2193 }
 0x5c0   :  { %v1472_v43 = vadd.f32 0.5, %v1471_v6  ;;  %v1480_v21 = vmul.f32 %v2192_v47, %v1468_v1  ;;  %v1476_v41 = vmul.f32 0.5, %v2194_v48  ;;  %v1974_v47 = vld [vmem:[#allocation9 + $0x50] sm:$0xff] }
 0x5c1   :  { %v1970_v48 = vld [vmem:[#allocation9 + $0x30] sm:$0xff] }
 0x5c2   :  { %v1479_v45 = vmul.f32 %v1472_v43, %v3019_v46  ;;  %v1477_v56 = vadd.f32 0.5, %v1476_v41  ;;  %v1975_v43 = vld [vmem:[#allocation9 + $0x58] sm:$0xff]  ;;  %v1969_v41 = vld [vmem:[#allocation9 + $0x28] sm:$0xff] }
 0x5c4   :  { %v3089_v51 = vadd.f32 %v1480_v21, %v1479_v45  ;;  %v1973_v45 = vld [vmem:[#allocation9 + $0x48] sm:$0xff]  ;;  %v1972_v21 = vld [vmem:[#allocation9 + $0x40] sm:$0xff] }
 0x5c6   :  { %2195 = vtanh.f32 %v3089_v51 }
 0x5d3   :  { %v2196_v35 = vpop.eup %2195 }
 0x5d4   :  { %v1483_v38 = vmul.f32 %v2196_v35, %v1477_v56  ;;  %v1968_v56 = vld [vmem:[#allocation9 + $0x20] sm:$0xff]  ;;  %v1967_v35 = vld [vmem:[#allocation9 + $0x18] sm:$0xff] }
 0x5d6   :  { %1621 = vmatmul.mubr.f32.vlgmr.msra.gmra.mxu0 %v1483_v38  ;;  %1692 = vmatmul.mubr.f32.vlgmr.msra.gmra.mxu1 %v1483_v38  ;;  %v1966_v38 = vld [vmem:[#allocation9 + $0x10] sm:$0xff] }
 0x5d7   :  { %1794 = vmatpush1.msra.mxu0 %v2760_v61  ;;  %1865 = vmatpush1.msra.mxu1 %v2762_v63  ;;  %v3408_v61 = vld [vmem:[#allocation18_spill] sm:$0xff]  ;;  %v3409_v63 = vld [vmem:[#allocation16_spill] sm:$0xff] }
 0x5d8   :  { %1795 = vmatprep.subr.mxu0 %v2766_v57  ;;  %1866 = vmatprep.subr.mxu1 %v2768_v60  ;;  %v3410_v57 = vld [vmem:[#allocation20_spill] sm:$0xff]  ;;  %v3411_v60 = vld [vmem:[#allocation17_spill] sm:$0xff] }
 0x5d9   :  { %1796 = vmatpush1.msra.mxu0 %v2772_v55  ;;  %1867 = vmatpush1.msra.mxu1 %v2774_v59  ;;  %v3412_v55 = vld [vmem:[#allocation22_spill] sm:$0xff]  ;;  %v3413_v59 = vld [vmem:[#allocation19_spill] sm:$0xff] }
 0x5da   :  { %1797 = vmatprep.subr.mxu0 %v2778_v62  ;;  %1868 = vmatprep.subr.mxu1 %v2780_v52  ;;  %v3414_v62 = vld [vmem:[#allocation24_spill] sm:$0xff]  ;;  %v3415_v52 = vld [vmem:[#allocation21_spill] sm:$0xff] }
 0x5db   :  { %1798 = vmatpush1.msra.mxu0 %v2784_v54  ;;  %1869 = vmatpush1.msra.mxu1 %v2786_v50  ;;  %v3416_v54 = vld [vmem:[#allocation26_spill] sm:$0xff]  ;;  %v3417_v50 = vld [vmem:[#allocation23_spill] sm:$0xff] }
 0x5dc   :  { %1799 = vmatprep.subr.mxu0 %v2790_v49  ;;  %1870 = vmatprep.subr.mxu1 %v2792_v53  ;;  %v3418_v49 = vld [vmem:[#allocation28_spill] sm:$0xff]  ;;  %v3419_v53 = vld [vmem:[#allocation25_spill] sm:$0xff] }
 0x5dd   :  { %1800 = vmatpush1.msra.mxu0 %v2796_v2  ;;  %1871 = vmatpush1.msra.mxu1 %v2798_v3  ;;  %v3420_v2 = vld [vmem:[#allocation30_spill] sm:$0xff]  ;;  %v3421_v3 = vld [vmem:[#allocation27_spill] sm:$0xff] }
 0x5de   :  { %1801 = vmatprep.subr.mxu0 %v2802_v4  ;;  %1872 = vmatprep.subr.mxu1 %v2804_v5  ;;  %v3422_v4 = vld [vmem:[#allocation32_spill] sm:$0xff]  ;;  %v3423_v5 = vld [vmem:[#allocation29_spill] sm:$0xff] }
 0x5df   :  { %1802 = vmatpush1.msra.mxu0 %v2808_v7  ;;  %1873 = vmatpush1.msra.mxu1 %v2810_v8  ;;  %v3424_v7 = vld [vmem:[#allocation33_spill] sm:$0xff]  ;;  %v3425_v8 = vld [vmem:[#allocation31_spill] sm:$0xff] }
 0x5e0   :  { %1803 = vmatprep.subr.mxu0 %v2814_v9  ;;  %1874 = vmatprep.subr.mxu1 %v2816_v10  ;;  %v3426_v9 = vmov 0.0   ;;  %v3427_v10 = vld [vmem:[#allocation34_spill] sm:$0xff] }
 0x5e1   :  { %1804 = vmatpush1.msra.mxu0 %v2820_v11  ;;  %1875 = vmatpush1.msra.mxu1 %v2822_v12  ;;  %v1487_v11 = vld [vmem:[#allocation4 + $0xc0] sm:$0xff] }
 0x5e2   :  { %1805 = vmatprep.subr.mxu0 %v2826_v13  ;;  %1876 = vmatprep.subr.mxu1 %v2828_v14  ;;  %v1488_v13 = vld [vmem:[#allocation4 + $0xc8] sm:$0xff] }
 0x5e3   :  { %1806 = vmatpush1.msra.mxu0 %v2832_v15  ;;  %1877 = vmatpush1.msra.mxu1 %v2834_v16 }
 0x5e4   :  { %1807 = vmatprep.subr.mxu0 %v2838_v17  ;;  %1878 = vmatprep.subr.mxu1 %v2840_v18  ;;  %v1489_v18 = vld [vmem:[#allocation4 + $0xd0] sm:$0xff] }
 0x5e5   :  { %1808 = vmatpush1.msra.mxu0 %v2844_v19  ;;  %1879 = vmatpush1.msra.mxu1 %v2846_v20 }
 0x5e6   :  { %1809 = vmatprep.subr.mxu0 %v2850_v22  ;;  %1880 = vmatprep.subr.mxu1 %v2852_v23  ;;  %v1490_v23 = vld [vmem:[#allocation4 + $0xd8] sm:$0xff] }
 0x5e7   :  { %1810 = vmatpush1.msra.mxu0 %v2854_v24  ;;  %1881 = vmatpush1.msra.mxu1 %v2858_v25 }
 0x5e8   :  { %1811 = vmatprep.subr.mxu0 %v2860_v26  ;;  %1882 = vmatprep.subr.mxu1 %v2862_v27 }
 0x5e9   :  { %1812 = vmatpush1.msra.mxu0 %v2866_v28  ;;  %1883 = vmatpush1.msra.mxu1 %v2868_v29 }
 0x5ea   :  { %1813 = vmatprep.subr.mxu0 %v2870_v30  ;;  %1884 = vmatprep.subr.mxu1 %v2874_v31 }
 0x5eb   :  { %1814 = vmatpush1.msra.mxu0 %v2876_v32  ;;  %1885 = vmatpush1.msra.mxu1 %v2878_v33 }
 0x5ec   :  { %1815 = vmatprep.subr.mxu0 %v2882_v34  ;;  %1886 = vmatprep.subr.mxu1 %v3408_v61  ;;  %v1965_v61 = vld [vmem:[#allocation9 + $0x8] sm:$0xff] }
 0x5ed   :  { %1816 = vmatpush1.msra.mxu0 %v3409_v63  ;;  %1887 = vmatpush1.msra.mxu1 %v3410_v57  ;;  %v1964_v63 = vld [vmem:[#allocation9] sm:$0xff] }
 0x5ee   :  { %1817 = vmatprep.subr.mxu0 %v3411_v60  ;;  %1888 = vmatprep.subr.mxu1 %v3412_v55  ;;  %v1724_v57 = vld [vmem:[#allocation4 + $0xe0] sm:$0xff]  ;;  %v1725_v55 = vld [vmem:[#allocation4 + $0xe8] sm:$0xff] }
 0x5ef   :  { %1818 = vmatpush1.msra.mxu0 %v3413_v59  ;;  %1889 = vmatpush1.msra.mxu1 %v3414_v62 }
 0x5f0   :  { %1819 = vmatprep.subr.mxu0 %v3415_v52  ;;  %1890 = vmatprep.subr.mxu1 %v3416_v54 }
 0x5f1   :  { %1820 = vmatpush1.msra.mxu0 %v3417_v50  ;;  %1891 = vmatpush1.msra.mxu1 %v3418_v49  ;;  %v1726_v50 = vld [vmem:[#allocation4 + $0xf0] sm:$0xff] }
 0x5f2   :  { %1821 = vmatprep.subr.mxu0 %v3419_v53  ;;  %1892 = vmatprep.subr.mxu1 %v3420_v2 }
 0x5f3   :  { %1822 = vmatpush1.msra.mxu0 %v3421_v3  ;;  %1893 = vmatpush1.msra.mxu1 %v3422_v4  ;;  %v1727_v3 = vld [vmem:[#allocation4 + $0xf8] sm:$0xff] }
 0x5f4   :  { %1823 = vmatprep.subr.mxu0 %v3423_v5  ;;  %1894 = vmatprep.subr.mxu1 %v3424_v7 }
 0x5f5   :  { %1824 = vmatpush1.msra.mxu0 %v3425_v8  ;;  %1857 = vmatprep.mubr.f32.mxu0 %v3426_v9 }
 0x5f6   :  { %1895 = vmatpush1.msra.mxu1 %v3427_v10  ;;  %1928 = vmatprep.mubr.f32.mxu1 %v3426_v9 }
 0x5f7   :  { %2092 = vmatprep.subr.mxu0 %v3426_v9 }
 0x696   :  { %v1622_v12 = vpop.f32.mrf.mxu0  ;;  %v1693_v19 = vpop.f32.mrf.mxu1 }
 0x697   :  { %v1698_v14 = vadd.f32 %v1622_v12, %v1487_v11  ;;  %v1700_v22 = vadd.f32 %v1693_v19, %v1489_v18 }
 0x698   :  { %v1624_v15 = vpop.f32.mrf.mxu0  ;;  %v1695_v24 = vpop.f32.mrf.mxu1 }
 0x699   :  { %v1702_v16 = vmul.f32 0.5, %v1698_v14  ;;  %v1699_v17 = vadd.f32 %v1624_v15, %v1488_v13  ;;  %v1701_v25 = vadd.f32 %v1695_v24, %v1490_v23  ;;  %v2074_v24 = vld [vmem:[%s3187_s3] ss:$0 sm:$0xff] }
 0x69b   :  { %2197 = vtanh.f32 %v1702_v16  ;;  %v1706_v20 = vmul.f32 0.5, %v1699_v17  ;;  %v1711_v26 = vmul.f32 0.5, %v1701_v25 }
 0x69d   :  { %2199 = vtanh.f32 %v1706_v20 }
 0x69e   :  { %2201 = vtanh.f32 %v1700_v22 }
 0x69f   :  { %2203 = vtanh.f32 %v1711_v26 }
 0x6a8   :  { %v2198_v27 = vpop.eup %2197 }
 0x6a9   :  { %v1704_v28 = vmul.f32 0.5, %v2198_v27 }
 0x6aa   :  { %v2200_v29 = vpop.eup %2199 }
 0x6ab   :  { %v1705_v30 = vadd.f32 0.5, %v1704_v28  ;;  %v1708_v31 = vmul.f32 0.5, %v2200_v29  ;;  %v2202_v33 = vpop.eup %2201 }
 0x6ac   :  { %v2204_v1 = vpop.eup %2203 }
 0x6ad   :  { %v1709_v32 = vadd.f32 0.5, %v1708_v31  ;;  %v1717_v46 = vmul.f32 %v2202_v33, %v1705_v30  ;;  %v1713_v58 = vmul.f32 0.5, %v2204_v1 }
 0x6af   :  { %v1716_v34 = vmul.f32 %v1709_v32, %v3089_v51  ;;  %v1714_v0 = vadd.f32 0.5, %v1713_v58  ;;  %v1971_v51 = vld [vmem:[#allocation9 + $0x38] sm:$0xff] }
 0x6b1   :  { %v3158_v6 = vadd.f32 %v1717_v46, %v1716_v34 }
 0x6b3   :  { %2205 = vtanh.f32 %v3158_v6 }
 0x6c0   :  { %v2206_v42 = vpop.eup %2205 }
 0x6c1   :  { %v1720_v37 = vmul.f32 %v2206_v42, %v1714_v0 }
 0x6c3   :  { %1858 = vmatmul.mubr.f32.vlgmr.msra.gmra.mxu0 %v1720_v37  ;;  %1929 = vmatmul.mubr.f32.vlgmr.msra.gmra.mxu1 %v1720_v37 }
 0x6c4   :  { %2093 = vmatpush3.msra.mxu0 %v1979_v36  ;;  %2124 = vmatprep.mubr.msk.f32.mxu0 %vm2311_vm0, %v3426_v9 }
 0x6c5   :  { %2094 = vmatprep.subr.mxu0 %v3426_v9 }
 0x6c6   :  { %2095 = vmatpush3.msra.mxu0 %v1978_v40 }
 0x6c7   :  { %2096 = vmatprep.subr.mxu0 %v3426_v9 }
 0x6c8   :  { %2097 = vmatpush3.msra.mxu0 %v1977_v39 }
 0x6c9   :  { %2098 = vmatprep.subr.mxu0 %v3426_v9 }
 0x6ca   :  { %2099 = vmatpush3.msra.mxu0 %v1976_v44 }
 0x6cb   :  { %2100 = vmatprep.subr.mxu0 %v3426_v9 }
 0x6cc   :  { %2101 = vmatpush3.msra.mxu0 %v1975_v43 }
 0x6cd   :  { %2102 = vmatprep.subr.mxu0 %v3426_v9 }
 0x6ce   :  { %2103 = vmatpush3.msra.mxu0 %v1974_v47 }
 0x6cf   :  { %2104 = vmatprep.subr.mxu0 %v3426_v9 }
 0x6d0   :  { %2105 = vmatpush3.msra.mxu0 %v1973_v45 }
 0x6d1   :  { %2106 = vmatprep.subr.mxu0 %v3426_v9 }
 0x6d2   :  { %2107 = vmatpush3.msra.mxu0 %v1972_v21 }
 0x6d3   :  { %2108 = vmatprep.subr.mxu0 %v3426_v9 }
 0x6d4   :  { %2109 = vmatpush3.msra.mxu0 %v1971_v51 }
 0x6d5   :  { %2110 = vmatprep.subr.mxu0 %v3426_v9 }
 0x6d6   :  { %2111 = vmatpush3.msra.mxu0 %v1970_v48 }
 0x6d7   :  { %2112 = vmatprep.subr.mxu0 %v3426_v9 }
 0x6d8   :  { %2113 = vmatpush3.msra.mxu0 %v1969_v41 }
 0x6d9   :  { %2114 = vmatprep.subr.mxu0 %v3426_v9 }
 0x6da   :  { %2115 = vmatpush3.msra.mxu0 %v1968_v56 }
 0x6db   :  { %2116 = vmatprep.subr.mxu0 %v3426_v9 }
 0x6dc   :  { %2117 = vmatpush3.msra.mxu0 %v1967_v35 }
 0x6dd   :  { %2118 = vmatprep.subr.mxu0 %v3426_v9 }
 0x6de   :  { %2119 = vmatpush3.msra.mxu0 %v1966_v38 }
 0x6df   :  { %2120 = vmatprep.subr.mxu0 %v3426_v9 }
 0x6e0   :  { %2121 = vmatpush3.msra.mxu0 %v1965_v61 }
 0x6e1   :  { %2122 = vmatprep.subr.mxu0 %v3426_v9 }
 0x6e2   :  { %2123 = vmatpush3.msra.mxu0 %v1964_v63 }
 0x783   :  { %v1859_v60 = vpop.f32.mrf.mxu0  ;;  %v1930_v49 = vpop.f32.mrf.mxu1 }
 0x784   :  { %v1935_v59 = vadd.f32 %v1859_v60, %v1724_v57  ;;  %v1937_v2 = vadd.f32 %v1930_v49, %v1726_v50 }
 0x785   :  { %v1861_v62 = vpop.f32.mrf.mxu0  ;;  %v1932_v4 = vpop.f32.mrf.mxu1 }
 0x786   :  { %v1939_v52 = vmul.f32 0.5, %v1935_v59  ;;  %v1936_v54 = vadd.f32 %v1861_v62, %v1725_v55  ;;  %v1938_v5 = vadd.f32 %v1932_v4, %v1727_v3 }
 0x788   :  { %2207 = vtanh.f32 %v1939_v52  ;;  %v1943_v53 = vmul.f32 0.5, %v1936_v54  ;;  %v1948_v7 = vmul.f32 0.5, %v1938_v5 }
 0x78a   :  { %2209 = vtanh.f32 %v1943_v53 }
 0x78b   :  { %2211 = vtanh.f32 %v1937_v2 }
 0x78c   :  { %2213 = vtanh.f32 %v1948_v7 }
 0x795   :  { %v2208_v8 = vpop.eup %2207 }
 0x796   :  { %v1941_v9 = vmul.f32 0.5, %v2208_v8 }
 0x797   :  { %v2210_v10 = vpop.eup %2209 }
 0x798   :  { %v1942_v11 = vadd.f32 0.5, %v1941_v9  ;;  %v1945_v12 = vmul.f32 0.5, %v2210_v10  ;;  %v2212_v14 = vpop.eup %2211 }
 0x799   :  { %v2214_v18 = vpop.eup %2213 }
 0x79a   :  { %v1946_v13 = vadd.f32 0.5, %v1945_v12  ;;  %v1954_v16 = vmul.f32 %v2212_v14, %v1942_v11  ;;  %v1950_v19 = vmul.f32 0.5, %v2214_v18 }
 0x79c   :  { %v1953_v15 = vmul.f32 %v1946_v13, %v3158_v6  ;;  %v1951_v20 = vadd.f32 0.5, %v1950_v19 }
 0x79e   :  { %v1955_v17 = vadd.f32 %v1954_v16, %v1953_v15 }
 0x7a0   :  { %2215 = vtanh.f32 %v1955_v17 }
 0x7ad   :  { %v2216_v22 = vpop.eup %2215 }
 0x7ae   :  { %v1957_v23 = vmul.f32 %v2216_v22, %v1951_v20 }
 0x7b0   :  { %2125 = vmatmul.mubr.f32.vlgmr.msra.gmra.mxu0 %v1957_v23 }
 0x870   :  { %v2053_v25 = vpop.f32.mrf.mxu0 }
 0x871   :  { %v2054_v26 = vadd.f32 %v2074_v24, %v2053_v25 }
 0x872   :  { %v2126_v27 = vpop.f32.mrf.mxu0 }
 0x873   :  { %2057 = vst [vmem:[#allocation10] sm:$0xff] %v2054_v26 }
 0x874   :  { %2288 = shalt.err (!%p2285_p5)
}
 0x875   :  { %2067 = dma.vmem_to_hbm [thread:$0]  %s2065_s8, 128, %s3188_s4, [#allocation6]  }
 0x876   :  { %2301 = dma.done.wait [#allocation6], 128  }
 0x877   :  { %2302 = vsyncadd [#allocation6], 4294967168 }
 0x878   :  { %2071 = vsyncpa [#allocation5], 1 }
 0x879   :  { %2072 = vsyncpa [#allocation8], 1 }
 0x87a   :  { %2073 = vsyncpa [#allocation6], 1 }

</bundles_post_ra>
